<compile_context>
chip_gen: v7x
topology: tpu7x:2x2x1
jax: 0.10.0
libtpu: 0.0.40
codegen_flags: <defaults>
</compile_context>

<pallas_src>
import functools

import jax
import jax.numpy as jnp
import numpy as np
from jax import lax
from jax.experimental import pallas as pl
from jax.experimental.pallas import tpu as pltpu


# ------------------------------- helpers ----------------------------------- #

def _round_up(x, m):
    return ((x + m - 1) // m) * m


def _cdiv(a, b):
    return -(-a // b)


# ----------------------------- Pallas kernel ------------------------------- #

def _mlp_max_kernel(n_layers, n_sample, x_ref, *refs):
    """refs = (w_0, shift_0, ..., w_{L-1}, shift_{L-1}, out_ref).

    x_ref   : (K, Cin_pad, TM)  grouped features, channels on sublanes (bf16)
    w_l     : (Cout_l, Cin_l)   1x1-conv weight, BN scale folded in (bf16)
    shift_l : (Cout_l, 1)       folded (conv bias + BN) shift (f32)
    out_ref : (Cout_L, TM)      max over the K/nsample axis (f32)
    """
    out_ref = refs[-1]
    # Hoist weight/shift reads out of the k loop (review #1): one vld per
    # kernel invocation instead of one per k iteration.
    ws = [refs[2 * l][...] for l in range(n_layers)]
    ss = [refs[2 * l + 1][...] for l in range(n_layers)]
    c_last, tm = out_ref.shape

    def body(k, acc):
        h = x_ref[k]                                  # (Cin_pad, TM) bf16
        for l in range(n_layers):
            # (Cout, Cin) @ (Cin, TM): contraction on channels, lanes = groups.
            y = jnp.dot(ws[l], h, preferred_element_type=jnp.float32)
            y = jnp.maximum(y + ss[l], 0.0)           # f32 epilogue (v5e-safe)
            # Carry activations in bf16 (halves live vreg/VMEM pressure);
            # keep the final layer in f32 for the max.
            h = y if l == n_layers - 1 else y.astype(ws[l + 1].dtype)
        return jnp.maximum(acc, h)                    # running max over K (VPU)

    # ReLU output is >= 0, so a zero init is exactly the max over K.
    acc0 = jnp.zeros((c_last, tm), jnp.float32)
    unroll = True if n_sample <= 8 else 4
    out_ref[...] = lax.fori_loop(0, n_sample, body, acc0, unroll=unroll)


def mlp_max_pallas(x, weights, shifts, compute_dtype=jnp.bfloat16):
    """x: [M, K, Cin] float32 -> [Cout_last, M] float32 (channels-first).

    `weights` are (Cout, Cin) with the BN scale folded into their rows;
    `shifts` are (Cout, 1) per-channel f32 offsets applied before ReLU.
    """
    M, K, Cin = x.shape
    n_layers = len(weights)
    c_last = weights[-1].shape[0]

    # Pad Cin to a multiple of 8 (sublane packing).  Zero-padded input
    # channels meet zero-padded weight columns -> mathematically exact.
    cin_p = _round_up(Cin, 8)
    w0 = weights[0]
    if cin_p != Cin:
        w0 = jnp.pad(w0, ((0, 0), (0, cin_p - Cin)))
    weights = [w0] + list(weights[1:])

    # ---- lane (group) tiling ------------------------------------------------
    # Cap the x block by a VMEM budget so double-buffered blocks stay well
    # inside every chip's default scoped VMEM (v5e 16 MiB, v6e/v7x 32 MiB,
    # v7x physical 64 MiB).  Force >=2 grid blocks when possible so both v7x
    # TensorCores get work; padding waste is bounded by one block.
    m128 = _round_up(max(M, 1), 128)
    lane_tiles = m128 // 128
    x_budget = 8 * 1024 * 1024                         # bytes for 2x x blocks
    bytes_per_lane = K * cin_p * 2                     # bf16
    tm_cap = max(128, min(2048, (x_budget // (2 * bytes_per_lane)) // 128 * 128))
    # TODO(synk): for very large K (group_all over big point clouds) the K axis
    # itself should be tiled/pipelined; here it is kept whole per block.
    blocks = max(1, _cdiv(m128, tm_cap))
    if blocks == 1 and lane_tiles >= 2:
        blocks = 2                                     # keep both v7x TCs busy
    tpb = _cdiv(lane_tiles, blocks)                    # 128-lane tiles / block
    TM = tpb * 128
    blocks = _cdiv(lane_tiles, tpb)
    M_pad = blocks * TM

    # Fused transpose + cast + pad (single XLA chain): (M,K,Cin) -> (K,Cin_p,M_pad)
    xt = jnp.transpose(x, (1, 2, 0)).astype(compute_dtype)
    xt = jnp.pad(xt, ((0, 0), (0, cin_p - Cin), (0, M_pad - M)))

    weights = [w.astype(compute_dtype) for w in weights]
    shifts = [s.astype(jnp.float32) for s in shifts]

    in_specs = [pl.BlockSpec((K, cin_p, TM), lambda i: (0, 0, i))]
    operands = [xt]
    for w, s in zip(weights, shifts):
        in_specs.append(pl.BlockSpec(w.shape, lambda i: (0, 0)))
        in_specs.append(pl.BlockSpec(s.shape, lambda i: (0, 0)))
        operands.extend([w, s])

    out = pl.pallas_call(
        functools.partial(_mlp_max_kernel, n_layers, K),
        out_shape=jax.ShapeDtypeStruct((c_last, M_pad), jnp.float32),
        grid_spec=pltpu.PrefetchScalarGridSpec(
            num_scalar_prefetch=0,
            grid=(blocks,),
            in_specs=in_specs,
            out_specs=pl.BlockSpec((c_last, TM), lambda i: (0, i)),
        ),
        compiler_params=pltpu.CompilerParams(
            dimension_semantics=("parallel",),
            # Safe on all chips (<= physical everywhere; raises v5e's 16 MiB
            # default); per-step footprint is kept to a few MiB by tm_cap.
            vmem_limit_bytes=32 * 1024 * 1024),
    )(*operands)
    return out[:, :M]                                   # (Cout_last, M)


# ----------------------- plain-JAX grouping glue --------------------------- #

def _square_distance(src, dst):
    # src [B,S,C], dst [B,N,C] -> [B,S,N]
    return jnp.sum((src[:, :, None, :] - dst[:, None, :, :]) ** 2, axis=-1)


def _index_points(points, idx):
    # points [B,N,C], idx [B,...] int -> [B,...,C]
    return jax.vmap(lambda p, i: p[i])(points, idx)


def _farthest_point_sample(xyz, npoint):
    B, N, _ = xyz.shape

    def body(i, carry):
        centroids, distance, farthest = carry
        centroids = centroids.at[:, i].set(farthest)
        centroid = jax.vmap(lambda p, f: p[f])(xyz, farthest)[:, None, :]
        dist = jnp.sum((xyz - centroid) ** 2, axis=-1)
        distance = jnp.minimum(distance, dist)
        farthest = jnp.argmax(distance, axis=-1).astype(jnp.int32)
        return centroids, distance, farthest

    # TODO(synk): PyTorch reference picks a random first index; we use 0
    # deterministically.
    carry = (jnp.zeros((B, npoint), jnp.int32),
             jnp.full((B, N), 1e10, jnp.float32),
             jnp.zeros((B,), jnp.int32))
    centroids, _, _ = jax.lax.fori_loop(0, npoint, body, carry)
    return centroids


def _query_ball_point(radius, nsample, xyz, new_xyz):
    B, N, _ = xyz.shape
    S = new_xyz.shape[1]
    sqrdists = _square_distance(new_xyz, xyz)                     # [B,S,N]
    group_idx = jnp.broadcast_to(jnp.arange(N, dtype=jnp.int32), (B, S, N))
    group_idx = jnp.where(sqrdists > radius ** 2, N, group_idx)
    group_idx = jnp.sort(group_idx, axis=-1)[:, :, :nsample]
    group_first = group_idx[:, :, :1]
    group_idx = jnp.where(group_idx == N, group_first, group_idx)
    return group_idx


def _sample_and_group(npoint, radius, nsample, xyz, points):
    fps_idx = _farthest_point_sample(xyz, npoint)                 # [B,S]
    new_xyz = _index_points(xyz, fps_idx)                         # [B,S,3]
    idx = _query_ball_point(radius, nsample, xyz, new_xyz)        # [B,S,K]
    grouped_xyz = _index_points(xyz, idx)                         # [B,S,K,3]
    grouped_xyz_norm = grouped_xyz - new_xyz[:, :, None, :]
    if points is not None:
        grouped_points = _index_points(points, idx)               # [B,S,K,D]
        new_points = jnp.concatenate([grouped_xyz_norm, grouped_points], -1)
    else:
        new_points = grouped_xyz_norm
    return new_xyz, new_points


def _sample_and_group_all(xyz, points):
    B, N, C = xyz.shape
    new_xyz = jnp.zeros((B, 1, C), xyz.dtype)
    grouped_xyz = xyz[:, None, :, :]
    if points is not None:
        new_points = jnp.concatenate([grouped_xyz, points[:, None, :, :]], -1)
    else:
        new_points = grouped_xyz
    return new_xyz, new_points


# ------------------------------ module ------------------------------------- #

class PointNetSAPallas:
    """PointNet++ SA layer with deterministic synthetic params.

    Conv2d(1x1) + BatchNorm2d (inference mode; conv bias and BN folded into
    the weight rows and a per-channel shift) + ReLU, followed by max over
    the nsample axis.
    """
    # TODO(synk): BatchNorm2d is implemented in inference mode (running stats
    # folded into the weights/shift); training-mode batch statistics not
    # reproduced.

    def __init__(self, n_points, qb_radius, n_sample, n_input_ch, mlp,
                 group_all, key, compute_dtype=jnp.bfloat16):
        self._n_points = n_points
        self._qb_radius = qb_radius
        self._n_sample = n_sample
        self._group_all = group_all
        self._compute_dtype = compute_dtype
        self.weights = []   # matmul weights [Cout, Cin] with BN scale folded
        self.shifts = []    # [Cout, 1]: folded (conv bias + BN) shift
        eps = 1e-5
        b_ch = n_input_ch
        for n_out in mlp:
            key, k1, k2, k3, k4, k5, k6 = jax.random.split(key, 7)
            w = jax.random.normal(k1, (n_out, b_ch), jnp.float32) * 0.1
            bias = jax.random.normal(k2, (n_out,), jnp.float32) * 0.05
            gamma = jax.random.uniform(k3, (n_out,), jnp.float32, 0.5, 1.5)
            beta = jax.random.normal(k4, (n_out,), jnp.float32) * 0.05
            r_mean = jax.random.normal(k5, (n_out,), jnp.float32) * 0.05
            r_var = jax.random.uniform(k6, (n_out,), jnp.float32, 0.5, 1.5)
            inv_std = 1.0 / jnp.sqrt(r_var + eps)
            scale = gamma * inv_std
            # (W x + bias) * scale + (beta - mean*scale)
            #   == (W*scale) x + ((bias - mean)*scale + beta)
            self.weights.append(w * scale[:, None])
            self.shifts.append(((bias - r_mean) * scale + beta)[:, None])
            b_ch = n_out

    def __call__(self, x_y_z, points):
        # x_y_z: [B, C, N], points: [B, D, N] or None
        xyz = jnp.transpose(x_y_z, (0, 2, 1))
        pts = None if points is None else jnp.transpose(points, (0, 2, 1))
        if self._group_all:
            new_xyz, new_points = _sample_and_group_all(xyz, pts)
        else:
            new_xyz, new_points = _sample_and_group(
                self._n_points, self._qb_radius, self._n_sample, xyz, pts)
        B, S, K, Cin = new_points.shape
        x = new_points.astype(jnp.float32).reshape(B * S, K, Cin)
        feat = mlp_max_pallas(x, self.weights, self.shifts,
                              compute_dtype=self._compute_dtype)  # [Co, B*S]
        c_out = feat.shape[0]
        new_points_out = jnp.transpose(feat.reshape(c_out, B, S), (1, 0, 2))
        new_xyz_out = jnp.transpose(new_xyz, (0, 2, 1))           # [B,C,S]
        return new_xyz_out, new_points_out


def _mlp_max_ref(new_points, weights, shifts, compute_dtype=jnp.bfloat16):
    """Pure-JAX reference of the Pallas hot path (same bf16 matmul recipe)."""
    x = new_points.astype(jnp.float32)                 # [B,S,K,Cin]
    for w, s in zip(weights, shifts):
        y = jnp.einsum('bskc,dc->bskd', x.astype(compute_dtype),
                       w.astype(compute_dtype),
                       preferred_element_type=jnp.float32)
        x = jnp.maximum(y + s[:, 0].astype(jnp.float32), 0.0)
    return jnp.max(x, axis=2)                          # [B,S,Cout]


# ------------------------------- main --------------------------------------- #

if __name__ == "__main__":
    key = jax.random.PRNGKey(0)
    k_xyz, k_pts, k_param = jax.random.split(key, 3)

    B, N, D = 2, 16, 4
    x_y_z = jax.random.normal(k_xyz, (B, 3, N), jnp.float32)   # [B, C=3, N]
    points = jax.random.normal(k_pts, (B, D, N), jnp.float32)  # [B, D, N]

    # grouped (FPS + ball query) configuration
    sa = PointNetSAPallas(n_points=8, qb_radius=0.8, n_sample=8,
                          n_input_ch=3 + D, mlp=[32, 32, 64],
                          group_all=False, key=k_param)
    new_xyz, new_feat = sa(x_y_z, points)
    jax.block_until_ready((new_xyz, new_feat))
    assert new_xyz.shape == (B, 3, 8) and new_feat.shape == (B, 64, 8)

    # group_all configuration (same params)
    sa_all = PointNetSAPallas(n_points=None, qb_radius=None, n_sample=None,
                              n_input_ch=3 + D, mlp=[32, 32, 64],
                              group_all=True, key=k_param)
    new_xyz_a, new_feat_a = sa_all(x_y_z, points)
    jax.block_until_ready((new_xyz_a, new_feat_a))
    assert new_xyz_a.shape == (B, 3, 1) and new_feat_a.shape == (B, 64, 1)

    # cross-check Pallas hot path against a pure-JAX reference
    xyz_t = jnp.transpose(x_y_z, (0, 2, 1))
    pts_t = jnp.transpose(points, (0, 2, 1))
    _, grp = _sample_and_group(8, 0.8, 8, xyz_t, pts_t)
    ref = jnp.transpose(_mlp_max_ref(grp, sa.weights, sa.shifts), (0, 2, 1))
    assert np.allclose(np.asarray(new_feat), np.asarray(ref),
                       atol=1e-3, rtol=1e-3)

    _, grp_all = _sample_and_group_all(xyz_t, pts_t)
    ref_all = jnp.transpose(
        _mlp_max_ref(grp_all, sa_all.weights, sa_all.shifts), (0, 2, 1))
    assert np.allclose(np.asarray(new_feat_a), np.asarray(ref_all),
                       atol=1e-3, rtol=1e-3)

    print("KERNEL_OK")
</pallas_src>

<mosaic_0001>
module attributes {stable_mosaic.version = 11 : i64} {
  func.func @_mlp_max_kernel(%arg0: i32, %arg1: memref<8x8x128xbf16, #tpu.memory_space<vmem>>, %arg2: memref<32x8xbf16, #tpu.memory_space<vmem>>, %arg3: memref<32x1xf32, #tpu.memory_space<vmem>>, %arg4: memref<32x32xbf16, #tpu.memory_space<vmem>>, %arg5: memref<32x1xf32, #tpu.memory_space<vmem>>, %arg6: memref<64x32xbf16, #tpu.memory_space<vmem>>, %arg7: memref<64x1xf32, #tpu.memory_space<vmem>>, %arg8: memref<64x128xf32, #tpu.memory_space<vmem>>) attributes {dimension_semantics = [#tpu.dimension_semantics<parallel>], iteration_bounds = array<i64: 1>, scalar_prefetch = 0 : i64, scratch_operands = 0 : i64, tpu.core_type = #tpu.core_type<tc>, window_params = [{transform_indices = @transform_0, window_bounds = array<i64: 8, 8, 128>}, {pipeline_mode = #tpu.pipeline_mode<synchronous>, transform_indices = @transform_1, window_bounds = array<i64: 32, 8>}, {pipeline_mode = #tpu.pipeline_mode<synchronous>, transform_indices = @transform_2, window_bounds = array<i64: 32, 1>}, {pipeline_mode = #tpu.pipeline_mode<synchronous>, transform_indices = @transform_3, window_bounds = array<i64: 32, 32>}, {pipeline_mode = #tpu.pipeline_mode<synchronous>, transform_indices = @transform_4, window_bounds = array<i64: 32, 1>}, {pipeline_mode = #tpu.pipeline_mode<synchronous>, transform_indices = @transform_5, window_bounds = array<i64: 64, 32>}, {pipeline_mode = #tpu.pipeline_mode<synchronous>, transform_indices = @transform_6, window_bounds = array<i64: 64, 1>}, {transform_indices = @transform_7, window_bounds = array<i64: 64, 128>}]} {
    %c0 = arith.constant 0 : index
    %c0_0 = arith.constant 0 : index
    %0 = vector.load %arg2[%c0, %c0_0] : memref<32x8xbf16, #tpu.memory_space<vmem>>, vector<32x8xbf16>
    %c0_1 = arith.constant 0 : index
    %c0_2 = arith.constant 0 : index
    %1 = vector.load %arg4[%c0_1, %c0_2] : memref<32x32xbf16, #tpu.memory_space<vmem>>, vector<32x32xbf16>
    %c0_3 = arith.constant 0 : index
    %c0_4 = arith.constant 0 : index
    %2 = vector.load %arg6[%c0_3, %c0_4] : memref<64x32xbf16, #tpu.memory_space<vmem>>, vector<64x32xbf16>
    %c0_5 = arith.constant 0 : index
    %c0_6 = arith.constant 0 : index
    %3 = vector.load %arg3[%c0_5, %c0_6] : memref<32x1xf32, #tpu.memory_space<vmem>>, vector<32x1xf32>
    %c0_7 = arith.constant 0 : index
    %c0_8 = arith.constant 0 : index
    %4 = vector.load %arg5[%c0_7, %c0_8] : memref<32x1xf32, #tpu.memory_space<vmem>>, vector<32x1xf32>
    %c0_9 = arith.constant 0 : index
    %c0_10 = arith.constant 0 : index
    %5 = vector.load %arg7[%c0_9, %c0_10] : memref<64x1xf32, #tpu.memory_space<vmem>>, vector<64x1xf32>
    %cst = arith.constant 0.000000e+00 : f32
    %6 = vector.broadcast %cst : f32 to vector<64x128xf32>
    %c0_i32 = arith.constant 0 : i32
    %7 = arith.index_cast %c0_i32 : i32 to index
    %c0_11 = arith.constant 0 : index
    %c0_12 = arith.constant 0 : index
    %8 = vector.load %arg1[%7, %c0_11, %c0_12] : memref<8x8x128xbf16, #tpu.memory_space<vmem>>, vector<1x8x128xbf16>
    %9 = vector.shape_cast %8 : vector<1x8x128xbf16> to vector<8x128xbf16>
    %cst_13 = arith.constant dense<0.000000e+00> : vector<32x128xf32>
    %10 = tpu.matmul %0, %9, %cst_13 {dimension_numbers = #tpu.dot_dimension_numbers<[1], [0], [0], [1], [0, 0, 1, 1], [], []>} : vector<32x8xbf16>, vector<8x128xbf16>, vector<32x128xf32> -> vector<32x128xf32>
    %11 = vector.broadcast %3 : vector<32x1xf32> to vector<32x128xf32>
    %12 = arith.addf %10, %11 : vector<32x128xf32>
    %cst_14 = arith.constant 0.000000e+00 : f32
    %13 = vector.broadcast %cst_14 : f32 to vector<32x128xf32>
    %14 = arith.maximumf %12, %13 : vector<32x128xf32>
    %15 = arith.truncf %14 : vector<32x128xf32> to vector<32x128xbf16>
    %cst_15 = arith.constant dense<0.000000e+00> : vector<32x128xf32>
    %16 = tpu.matmul %1, %15, %cst_15 {dimension_numbers = #tpu.dot_dimension_numbers<[1], [0], [0], [1], [0, 0, 1, 1], [], []>} : vector<32x32xbf16>, vector<32x128xbf16>, vector<32x128xf32> -> vector<32x128xf32>
    %17 = vector.broadcast %4 : vector<32x1xf32> to vector<32x128xf32>
    %18 = arith.addf %16, %17 : vector<32x128xf32>
    %cst_16 = arith.constant 0.000000e+00 : f32
    %19 = vector.broadcast %cst_16 : f32 to vector<32x128xf32>
    %20 = arith.maximumf %18, %19 : vector<32x128xf32>
    %21 = arith.truncf %20 : vector<32x128xf32> to vector<32x128xbf16>
    %cst_17 = arith.constant dense<0.000000e+00> : vector<64x128xf32>
    %22 = tpu.matmul %2, %21, %cst_17 {dimension_numbers = #tpu.dot_dimension_numbers<[1], [0], [0], [1], [0, 0, 1, 1], [], []>} : vector<64x32xbf16>, vector<32x128xbf16>, vector<64x128xf32> -> vector<64x128xf32>
    %23 = vector.broadcast %5 : vector<64x1xf32> to vector<64x128xf32>
    %24 = arith.addf %22, %23 : vector<64x128xf32>
    %cst_18 = arith.constant 0.000000e+00 : f32
    %25 = vector.broadcast %cst_18 : f32 to vector<64x128xf32>
    %26 = arith.maximumf %24, %25 : vector<64x128xf32>
    %27 = arith.maximumf %6, %26 : vector<64x128xf32>
    %c1_i32 = arith.constant 1 : i32
    %28 = arith.index_cast %c1_i32 : i32 to index
    %c0_19 = arith.constant 0 : index
    %c0_20 = arith.constant 0 : index
    %29 = vector.load %arg1[%28, %c0_19, %c0_20] : memref<8x8x128xbf16, #tpu.memory_space<vmem>>, vector<1x8x128xbf16>
    %30 = vector.shape_cast %29 : vector<1x8x128xbf16> to vector<8x128xbf16>
    %cst_21 = arith.constant dense<0.000000e+00> : vector<32x128xf32>
    %31 = tpu.matmul %0, %30, %cst_21 {dimension_numbers = #tpu.dot_dimension_numbers<[1], [0], [0], [1], [0, 0, 1, 1], [], []>} : vector<32x8xbf16>, vector<8x128xbf16>, vector<32x128xf32> -> vector<32x128xf32>
    %32 = vector.broadcast %3 : vector<32x1xf32> to vector<32x128xf32>
    %33 = arith.addf %31, %32 : vector<32x128xf32>
    %cst_22 = arith.constant 0.000000e+00 : f32
    %34 = vector.broadcast %cst_22 : f32 to vector<32x128xf32>
    %35 = arith.maximumf %33, %34 : vector<32x128xf32>
    %36 = arith.truncf %35 : vector<32x128xf32> to vector<32x128xbf16>
    %cst_23 = arith.constant dense<0.000000e+00> : vector<32x128xf32>
    %37 = tpu.matmul %1, %36, %cst_23 {dimension_numbers = #tpu.dot_dimension_numbers<[1], [0], [0], [1], [0, 0, 1, 1], [], []>} : vector<32x32xbf16>, vector<32x128xbf16>, vector<32x128xf32> -> vector<32x128xf32>
    %38 = vector.broadcast %4 : vector<32x1xf32> to vector<32x128xf32>
    %39 = arith.addf %37, %38 : vector<32x128xf32>
    %cst_24 = arith.constant 0.000000e+00 : f32
    %40 = vector.broadcast %cst_24 : f32 to vector<32x128xf32>
    %41 = arith.maximumf %39, %40 : vector<32x128xf32>
    %42 = arith.truncf %41 : vector<32x128xf32> to vector<32x128xbf16>
    %cst_25 = arith.constant dense<0.000000e+00> : vector<64x128xf32>
    %43 = tpu.matmul %2, %42, %cst_25 {dimension_numbers = #tpu.dot_dimension_numbers<[1], [0], [0], [1], [0, 0, 1, 1], [], []>} : vector<64x32xbf16>, vector<32x128xbf16>, vector<64x128xf32> -> vector<64x128xf32>
    %44 = vector.broadcast %5 : vector<64x1xf32> to vector<64x128xf32>
    %45 = arith.addf %43, %44 : vector<64x128xf32>
    %cst_26 = arith.constant 0.000000e+00 : f32
    %46 = vector.broadcast %cst_26 : f32 to vector<64x128xf32>
    %47 = arith.maximumf %45, %46 : vector<64x128xf32>
    %48 = arith.maximumf %27, %47 : vector<64x128xf32>
    %c2_i32 = arith.constant 2 : i32
    %49 = arith.index_cast %c2_i32 : i32 to index
    %c0_27 = arith.constant 0 : index
    %c0_28 = arith.constant 0 : index
    %50 = vector.load %arg1[%49, %c0_27, %c0_28] : memref<8x8x128xbf16, #tpu.memory_space<vmem>>, vector<1x8x128xbf16>
    %51 = vector.shape_cast %50 : vector<1x8x128xbf16> to vector<8x128xbf16>
    %cst_29 = arith.constant dense<0.000000e+00> : vector<32x128xf32>
    %52 = tpu.matmul %0, %51, %cst_29 {dimension_numbers = #tpu.dot_dimension_numbers<[1], [0], [0], [1], [0, 0, 1, 1], [], []>} : vector<32x8xbf16>, vector<8x128xbf16>, vector<32x128xf32> -> vector<32x128xf32>
    %53 = vector.broadcast %3 : vector<32x1xf32> to vector<32x128xf32>
    %54 = arith.addf %52, %53 : vector<32x128xf32>
    %cst_30 = arith.constant 0.000000e+00 : f32
    %55 = vector.broadcast %cst_30 : f32 to vector<32x128xf32>
    %56 = arith.maximumf %54, %55 : vector<32x128xf32>
    %57 = arith.truncf %56 : vector<32x128xf32> to vector<32x128xbf16>
    %cst_31 = arith.constant dense<0.000000e+00> : vector<32x128xf32>
    %58 = tpu.matmul %1, %57, %cst_31 {dimension_numbers = #tpu.dot_dimension_numbers<[1], [0], [0], [1], [0, 0, 1, 1], [], []>} : vector<32x32xbf16>, vector<32x128xbf16>, vector<32x128xf32> -> vector<32x128xf32>
    %59 = vector.broadcast %4 : vector<32x1xf32> to vector<32x128xf32>
    %60 = arith.addf %58, %59 : vector<32x128xf32>
    %cst_32 = arith.constant 0.000000e+00 : f32
    %61 = vector.broadcast %cst_32 : f32 to vector<32x128xf32>
    %62 = arith.maximumf %60, %61 : vector<32x128xf32>
    %63 = arith.truncf %62 : vector<32x128xf32> to vector<32x128xbf16>
    %cst_33 = arith.constant dense<0.000000e+00> : vector<64x128xf32>
    %64 = tpu.matmul %2, %63, %cst_33 {dimension_numbers = #tpu.dot_dimension_numbers<[1], [0], [0], [1], [0, 0, 1, 1], [], []>} : vector<64x32xbf16>, vector<32x128xbf16>, vector<64x128xf32> -> vector<64x128xf32>
    %65 = vector.broadcast %5 : vector<64x1xf32> to vector<64x128xf32>
    %66 = arith.addf %64, %65 : vector<64x128xf32>
    %cst_34 = arith.constant 0.000000e+00 : f32
    %67 = vector.broadcast %cst_34 : f32 to vector<64x128xf32>
    %68 = arith.maximumf %66, %67 : vector<64x128xf32>
    %69 = arith.maximumf %48, %68 : vector<64x128xf32>
    %c3_i32 = arith.constant 3 : i32
    %70 = arith.index_cast %c3_i32 : i32 to index
    %c0_35 = arith.constant 0 : index
    %c0_36 = arith.constant 0 : index
    %71 = vector.load %arg1[%70, %c0_35, %c0_36] : memref<8x8x128xbf16, #tpu.memory_space<vmem>>, vector<1x8x128xbf16>
    %72 = vector.shape_cast %71 : vector<1x8x128xbf16> to vector<8x128xbf16>
    %cst_37 = arith.constant dense<0.000000e+00> : vector<32x128xf32>
    %73 = tpu.matmul %0, %72, %cst_37 {dimension_numbers = #tpu.dot_dimension_numbers<[1], [0], [0], [1], [0, 0, 1, 1], [], []>} : vector<32x8xbf16>, vector<8x128xbf16>, vector<32x128xf32> -> vector<32x128xf32>
    %74 = vector.broadcast %3 : vector<32x1xf32> to vector<32x128xf32>
    %75 = arith.addf %73, %74 : vector<32x128xf32>
    %cst_38 = arith.constant 0.000000e+00 : f32
    %76 = vector.broadcast %cst_38 : f32 to vector<32x128xf32>
    %77 = arith.maximumf %75, %76 : vector<32x128xf32>
    %78 = arith.truncf %77 : vector<32x128xf32> to vector<32x128xbf16>
    %cst_39 = arith.constant dense<0.000000e+00> : vector<32x128xf32>
    %79 = tpu.matmul %1, %78, %cst_39 {dimension_numbers = #tpu.dot_dimension_numbers<[1], [0], [0], [1], [0, 0, 1, 1], [], []>} : vector<32x32xbf16>, vector<32x128xbf16>, vector<32x128xf32> -> vector<32x128xf32>
    %80 = vector.broadcast %4 : vector<32x1xf32> to vector<32x128xf32>
    %81 = arith.addf %79, %80 : vector<32x128xf32>
    %cst_40 = arith.constant 0.000000e+00 : f32
    %82 = vector.broadcast %cst_40 : f32 to vector<32x128xf32>
    %83 = arith.maximumf %81, %82 : vector<32x128xf32>
    %84 = arith.truncf %83 : vector<32x128xf32> to vector<32x128xbf16>
    %cst_41 = arith.constant dense<0.000000e+00> : vector<64x128xf32>
    %85 = tpu.matmul %2, %84, %cst_41 {dimension_numbers = #tpu.dot_dimension_numbers<[1], [0], [0], [1], [0, 0, 1, 1], [], []>} : vector<64x32xbf16>, vector<32x128xbf16>, vector<64x128xf32> -> vector<64x128xf32>
    %86 = vector.broadcast %5 : vector<64x1xf32> to vector<64x128xf32>
    %87 = arith.addf %85, %86 : vector<64x128xf32>
    %cst_42 = arith.constant 0.000000e+00 : f32
    %88 = vector.broadcast %cst_42 : f32 to vector<64x128xf32>
    %89 = arith.maximumf %87, %88 : vector<64x128xf32>
    %90 = arith.maximumf %69, %89 : vector<64x128xf32>
    %c4_i32 = arith.constant 4 : i32
    %91 = arith.index_cast %c4_i32 : i32 to index
    %c0_43 = arith.constant 0 : index
    %c0_44 = arith.constant 0 : index
    %92 = vector.load %arg1[%91, %c0_43, %c0_44] : memref<8x8x128xbf16, #tpu.memory_space<vmem>>, vector<1x8x128xbf16>
    %93 = vector.shape_cast %92 : vector<1x8x128xbf16> to vector<8x128xbf16>
    %cst_45 = arith.constant dense<0.000000e+00> : vector<32x128xf32>
    %94 = tpu.matmul %0, %93, %cst_45 {dimension_numbers = #tpu.dot_dimension_numbers<[1], [0], [0], [1], [0, 0, 1, 1], [], []>} : vector<32x8xbf16>, vector<8x128xbf16>, vector<32x128xf32> -> vector<32x128xf32>
    %95 = vector.broadcast %3 : vector<32x1xf32> to vector<32x128xf32>
    %96 = arith.addf %94, %95 : vector<32x128xf32>
    %cst_46 = arith.constant 0.000000e+00 : f32
    %97 = vector.broadcast %cst_46 : f32 to vector<32x128xf32>
    %98 = arith.maximumf %96, %97 : vector<32x128xf32>
    %99 = arith.truncf %98 : vector<32x128xf32> to vector<32x128xbf16>
    %cst_47 = arith.constant dense<0.000000e+00> : vector<32x128xf32>
    %100 = tpu.matmul %1, %99, %cst_47 {dimension_numbers = #tpu.dot_dimension_numbers<[1], [0], [0], [1], [0, 0, 1, 1], [], []>} : vector<32x32xbf16>, vector<32x128xbf16>, vector<32x128xf32> -> vector<32x128xf32>
    %101 = vector.broadcast %4 : vector<32x1xf32> to vector<32x128xf32>
    %102 = arith.addf %100, %101 : vector<32x128xf32>
    %cst_48 = arith.constant 0.000000e+00 : f32
    %103 = vector.broadcast %cst_48 : f32 to vector<32x128xf32>
    %104 = arith.maximumf %102, %103 : vector<32x128xf32>
    %105 = arith.truncf %104 : vector<32x128xf32> to vector<32x128xbf16>
    %cst_49 = arith.constant dense<0.000000e+00> : vector<64x128xf32>
    %106 = tpu.matmul %2, %105, %cst_49 {dimension_numbers = #tpu.dot_dimension_numbers<[1], [0], [0], [1], [0, 0, 1, 1], [], []>} : vector<64x32xbf16>, vector<32x128xbf16>, vector<64x128xf32> -> vector<64x128xf32>
    %107 = vector.broadcast %5 : vector<64x1xf32> to vector<64x128xf32>
    %108 = arith.addf %106, %107 : vector<64x128xf32>
    %cst_50 = arith.constant 0.000000e+00 : f32
    %109 = vector.broadcast %cst_50 : f32 to vector<64x128xf32>
    %110 = arith.maximumf %108, %109 : vector<64x128xf32>
    %111 = arith.maximumf %90, %110 : vector<64x128xf32>
    %c5_i32 = arith.constant 5 : i32
    %112 = arith.index_cast %c5_i32 : i32 to index
    %c0_51 = arith.constant 0 : index
    %c0_52 = arith.constant 0 : index
    %113 = vector.load %arg1[%112, %c0_51, %c0_52] : memref<8x8x128xbf16, #tpu.memory_space<vmem>>, vector<1x8x128xbf16>
    %114 = vector.shape_cast %113 : vector<1x8x128xbf16> to vector<8x128xbf16>
    %cst_53 = arith.constant dense<0.000000e+00> : vector<32x128xf32>
    %115 = tpu.matmul %0, %114, %cst_53 {dimension_numbers = #tpu.dot_dimension_numbers<[1], [0], [0], [1], [0, 0, 1, 1], [], []>} : vector<32x8xbf16>, vector<8x128xbf16>, vector<32x128xf32> -> vector<32x128xf32>
    %116 = vector.broadcast %3 : vector<32x1xf32> to vector<32x128xf32>
    %117 = arith.addf %115, %116 : vector<32x128xf32>
    %cst_54 = arith.constant 0.000000e+00 : f32
    %118 = vector.broadcast %cst_54 : f32 to vector<32x128xf32>
    %119 = arith.maximumf %117, %118 : vector<32x128xf32>
    %120 = arith.truncf %119 : vector<32x128xf32> to vector<32x128xbf16>
    %cst_55 = arith.constant dense<0.000000e+00> : vector<32x128xf32>
    %121 = tpu.matmul %1, %120, %cst_55 {dimension_numbers = #tpu.dot_dimension_numbers<[1], [0], [0], [1], [0, 0, 1, 1], [], []>} : vector<32x32xbf16>, vector<32x128xbf16>, vector<32x128xf32> -> vector<32x128xf32>
    %122 = vector.broadcast %4 : vector<32x1xf32> to vector<32x128xf32>
    %123 = arith.addf %121, %122 : vector<32x128xf32>
    %cst_56 = arith.constant 0.000000e+00 : f32
    %124 = vector.broadcast %cst_56 : f32 to vector<32x128xf32>
    %125 = arith.maximumf %123, %124 : vector<32x128xf32>
    %126 = arith.truncf %125 : vector<32x128xf32> to vector<32x128xbf16>
    %cst_57 = arith.constant dense<0.000000e+00> : vector<64x128xf32>
    %127 = tpu.matmul %2, %126, %cst_57 {dimension_numbers = #tpu.dot_dimension_numbers<[1], [0], [0], [1], [0, 0, 1, 1], [], []>} : vector<64x32xbf16>, vector<32x128xbf16>, vector<64x128xf32> -> vector<64x128xf32>
    %128 = vector.broadcast %5 : vector<64x1xf32> to vector<64x128xf32>
    %129 = arith.addf %127, %128 : vector<64x128xf32>
    %cst_58 = arith.constant 0.000000e+00 : f32
    %130 = vector.broadcast %cst_58 : f32 to vector<64x128xf32>
    %131 = arith.maximumf %129, %130 : vector<64x128xf32>
    %132 = arith.maximumf %111, %131 : vector<64x128xf32>
    %c6_i32 = arith.constant 6 : i32
    %133 = arith.index_cast %c6_i32 : i32 to index
    %c0_59 = arith.constant 0 : index
    %c0_60 = arith.constant 0 : index
    %134 = vector.load %arg1[%133, %c0_59, %c0_60] : memref<8x8x128xbf16, #tpu.memory_space<vmem>>, vector<1x8x128xbf16>
    %135 = vector.shape_cast %134 : vector<1x8x128xbf16> to vector<8x128xbf16>
    %cst_61 = arith.constant dense<0.000000e+00> : vector<32x128xf32>
    %136 = tpu.matmul %0, %135, %cst_61 {dimension_numbers = #tpu.dot_dimension_numbers<[1], [0], [0], [1], [0, 0, 1, 1], [], []>} : vector<32x8xbf16>, vector<8x128xbf16>, vector<32x128xf32> -> vector<32x128xf32>
    %137 = vector.broadcast %3 : vector<32x1xf32> to vector<32x128xf32>
    %138 = arith.addf %136, %137 : vector<32x128xf32>
    %cst_62 = arith.constant 0.000000e+00 : f32
    %139 = vector.broadcast %cst_62 : f32 to vector<32x128xf32>
    %140 = arith.maximumf %138, %139 : vector<32x128xf32>
    %141 = arith.truncf %140 : vector<32x128xf32> to vector<32x128xbf16>
    %cst_63 = arith.constant dense<0.000000e+00> : vector<32x128xf32>
    %142 = tpu.matmul %1, %141, %cst_63 {dimension_numbers = #tpu.dot_dimension_numbers<[1], [0], [0], [1], [0, 0, 1, 1], [], []>} : vector<32x32xbf16>, vector<32x128xbf16>, vector<32x128xf32> -> vector<32x128xf32>
    %143 = vector.broadcast %4 : vector<32x1xf32> to vector<32x128xf32>
    %144 = arith.addf %142, %143 : vector<32x128xf32>
    %cst_64 = arith.constant 0.000000e+00 : f32
    %145 = vector.broadcast %cst_64 : f32 to vector<32x128xf32>
    %146 = arith.maximumf %144, %145 : vector<32x128xf32>
    %147 = arith.truncf %146 : vector<32x128xf32> to vector<32x128xbf16>
    %cst_65 = arith.constant dense<0.000000e+00> : vector<64x128xf32>
    %148 = tpu.matmul %2, %147, %cst_65 {dimension_numbers = #tpu.dot_dimension_numbers<[1], [0], [0], [1], [0, 0, 1, 1], [], []>} : vector<64x32xbf16>, vector<32x128xbf16>, vector<64x128xf32> -> vector<64x128xf32>
    %149 = vector.broadcast %5 : vector<64x1xf32> to vector<64x128xf32>
    %150 = arith.addf %148, %149 : vector<64x128xf32>
    %cst_66 = arith.constant 0.000000e+00 : f32
    %151 = vector.broadcast %cst_66 : f32 to vector<64x128xf32>
    %152 = arith.maximumf %150, %151 : vector<64x128xf32>
    %153 = arith.maximumf %132, %152 : vector<64x128xf32>
    %c7_i32 = arith.constant 7 : i32
    %154 = arith.index_cast %c7_i32 : i32 to index
    %c0_67 = arith.constant 0 : index
    %c0_68 = arith.constant 0 : index
    %155 = vector.load %arg1[%154, %c0_67, %c0_68] : memref<8x8x128xbf16, #tpu.memory_space<vmem>>, vector<1x8x128xbf16>
    %156 = vector.shape_cast %155 : vector<1x8x128xbf16> to vector<8x128xbf16>
    %cst_69 = arith.constant dense<0.000000e+00> : vector<32x128xf32>
    %157 = tpu.matmul %0, %156, %cst_69 {dimension_numbers = #tpu.dot_dimension_numbers<[1], [0], [0], [1], [0, 0, 1, 1], [], []>} : vector<32x8xbf16>, vector<8x128xbf16>, vector<32x128xf32> -> vector<32x128xf32>
    %158 = vector.broadcast %3 : vector<32x1xf32> to vector<32x128xf32>
    %159 = arith.addf %157, %158 : vector<32x128xf32>
    %cst_70 = arith.constant 0.000000e+00 : f32
    %160 = vector.broadcast %cst_70 : f32 to vector<32x128xf32>
    %161 = arith.maximumf %159, %160 : vector<32x128xf32>
    %162 = arith.truncf %161 : vector<32x128xf32> to vector<32x128xbf16>
    %cst_71 = arith.constant dense<0.000000e+00> : vector<32x128xf32>
    %163 = tpu.matmul %1, %162, %cst_71 {dimension_numbers = #tpu.dot_dimension_numbers<[1], [0], [0], [1], [0, 0, 1, 1], [], []>} : vector<32x32xbf16>, vector<32x128xbf16>, vector<32x128xf32> -> vector<32x128xf32>
    %164 = vector.broadcast %4 : vector<32x1xf32> to vector<32x128xf32>
    %165 = arith.addf %163, %164 : vector<32x128xf32>
    %cst_72 = arith.constant 0.000000e+00 : f32
    %166 = vector.broadcast %cst_72 : f32 to vector<32x128xf32>
    %167 = arith.maximumf %165, %166 : vector<32x128xf32>
    %168 = arith.truncf %167 : vector<32x128xf32> to vector<32x128xbf16>
    %cst_73 = arith.constant dense<0.000000e+00> : vector<64x128xf32>
    %169 = tpu.matmul %2, %168, %cst_73 {dimension_numbers = #tpu.dot_dimension_numbers<[1], [0], [0], [1], [0, 0, 1, 1], [], []>} : vector<64x32xbf16>, vector<32x128xbf16>, vector<64x128xf32> -> vector<64x128xf32>
    %170 = vector.broadcast %5 : vector<64x1xf32> to vector<64x128xf32>
    %171 = arith.addf %169, %170 : vector<64x128xf32>
    %cst_74 = arith.constant 0.000000e+00 : f32
    %172 = vector.broadcast %cst_74 : f32 to vector<64x128xf32>
    %173 = arith.maximumf %171, %172 : vector<64x128xf32>
    %174 = arith.maximumf %153, %173 : vector<64x128xf32>
    %c8_i32 = arith.constant 8 : i32
    %c0_75 = arith.constant 0 : index
    %c0_76 = arith.constant 0 : index
    %175 = vector.load %arg8[%c0_75, %c0_76] : memref<64x128xf32, #tpu.memory_space<vmem>>, vector<64x128xf32>
    tpu.vector_store %arg8[%c0_75, %c0_76], %174 {strides = array<i32>} : memref<64x128xf32, #tpu.memory_space<vmem>>, vector<64x128xf32>,
    return
  }
  func.func @transform_0(%arg0: i32) -> (i32, i32, i32) {
    %c0_i32 = arith.constant 0 : i32
    %c0_i32_0 = arith.constant 0 : i32
    %c0_i32_1 = arith.constant 0 : i32
    return %c0_i32, %c0_i32_0, %arg0 : i32, i32, i32
  }
  func.func @transform_1(%arg0: i32) -> (i32, i32) {
    %c0_i32 = arith.constant 0 : i32
    %c0_i32_0 = arith.constant 0 : i32
    %c0_i32_1 = arith.constant 0 : i32
    return %c0_i32, %c0_i32_0 : i32, i32
  }
  func.func @transform_2(%arg0: i32) -> (i32, i32) {
    %c0_i32 = arith.constant 0 : i32
    %c0_i32_0 = arith.constant 0 : i32
    %c0_i32_1 = arith.constant 0 : i32
    return %c0_i32, %c0_i32_0 : i32, i32
  }
  func.func @transform_3(%arg0: i32) -> (i32, i32) {
    %c0_i32 = arith.constant 0 : i32
    %c0_i32_0 = arith.constant 0 : i32
    %c0_i32_1 = arith.constant 0 : i32
    return %c0_i32, %c0_i32_0 : i32, i32
  }
  func.func @transform_4(%arg0: i32) -> (i32, i32) {
    %c0_i32 = arith.constant 0 : i32
    %c0_i32_0 = arith.constant 0 : i32
    %c0_i32_1 = arith.constant 0 : i32
    return %c0_i32, %c0_i32_0 : i32, i32
  }
  func.func @transform_5(%arg0: i32) -> (i32, i32) {
    %c0_i32 = arith.constant 0 : i32
    %c0_i32_0 = arith.constant 0 : i32
    %c0_i32_1 = arith.constant 0 : i32
    return %c0_i32, %c0_i32_0 : i32, i32
  }
  func.func @transform_6(%arg0: i32) -> (i32, i32) {
    %c0_i32 = arith.constant 0 : i32
    %c0_i32_0 = arith.constant 0 : i32
    %c0_i32_1 = arith.constant 0 : i32
    return %c0_i32, %c0_i32_0 : i32, i32
  }
  func.func @transform_7(%arg0: i32) -> (i32, i32) {
    %c0_i32 = arith.constant 0 : i32
    %c0_i32_0 = arith.constant 0 : i32
    return %c0_i32, %arg0 : i32, i32
  }
}

</mosaic_0001>

<bundles_post_ra>
// kernel: tpu_custom_call.1
= control target key start
LH: loop header
LB: loop body
LE: loop exit
PB: predicated region body
PF: predicated region fallthrough
CT: control target
= control target key end

     0   :  { %vm98_vm0 = vcmask 1043456   ;;  %vm91_vm1 = vcmask 64512   ;;  %v2242_v5 = vmov 0   ;;  %s2860_s0 = inlined_call_operand.vmem [shape: bf16[8,8,128], index: 0, kind: input, shape index: {}]   ;;  %s2861_s1 = inlined_call_operand.vmem [shape: bf16[32,8], index: 1, kind: input, shape index: {}]   ;;  %s2862_s2 = inlined_call_operand.vmem [shape: f32[32,1], index: 2, kind: input, shape index: {}]   ;;  %s2863_s3 = inlined_call_operand.vmem [shape: bf16[32,32], index: 3, kind: input, shape index: {}]   ;;  %s2864_s4 = inlined_call_operand.vmem [shape: f32[32,1], index: 4, kind: input, shape index: {}]   ;;  %s2865_s5 = inlined_call_operand.vmem [shape: bf16[64,32], index: 5, kind: input, shape index: {}]   ;;  %s2866_s6 = inlined_call_operand.vmem [shape: f32[64,1], index: 6, kind: input, shape index: {}]   ;;  %s2867_s7 = inlined_call_operand.hbm [shape: f32[64,128], index: 7, kind: output, shape index: {}]  }
   0x1   :  { %v60_v0 = vld [vmem:[%s2860_s0] sm:$0xf]  ;;  %v2301_v3 = vld [vmem:[%s2861_s1 + $0x8] sm:$0xff]   ;;  %2201 = vset.pattern.permute.xlu0 %v2242_v5  ;;  %2202 = vset.pattern.permute.xlu1 %v2242_v5  ;;  %v46_v6 = vld [vmem:[%s2862_s2 + $0x10] sm:$0xff] }
   0x2   :  { %v2292_v1 = vld [vmem:[%s2861_s1] sm:$0xff]   ;;  %2189 = vmatprep.subr.msk.bf16.mxu1 %vm98_vm0, %v60_v0  ;;  %v100_v2 = vsel %vm98_vm0, %v60_v0, 0  ;;  %73 = vperm.xlu1 %2202, %v46_v6   ;;  %v45_v7 = vld [vmem:[%s2862_s2 + $0x8] sm:$0xff]  ;;  %v47_v8 = vld [vmem:[%s2862_s2 + $0x18] sm:$0xff] }
   0x3   :  { %1982 = vmatpush3.bf16.msra.mxu1 %v100_v2  ;;  %1983 = vmatprep.mubr.msk.bf16.mxu1 %vm91_vm1, %v2292_v1  ;;  %v44_v4 = vld [vmem:[%s2862_s2] sm:$0xff]  ;;  %v49_v10 = vld [vmem:[%s2864_s4 + $0x8] sm:$0xff] }
   0x4   :  { %63 = vperm.xlu0 %2201, %v44_v4   ;;  %v48_v9 = vld [vmem:[%s2864_s4] sm:$0xff] }
   0x6   :  { %1984 = vmatmul.mubr.msk.bf16.vlgmr.msra.gmra.mrb[0].mxu1 %vm91_vm1, %v2301_v3  ;;  %78 = vperm.xlu1 %2202, %v47_v8  }
   0x8   :  { %68 = vperm.xlu0 %2201, %v45_v7  }
   0xa   :  { %164 = vperm.xlu1 %2202, %v49_v10  }
   0xc   :  { %159 = vperm.xlu0 %2201, %v48_v9  }
   0xd   :  { %12 = vsyncpa [#allocation3], 0  ;;  %v50_v11 = vld [vmem:[%s2864_s4 + $0x10] sm:$0xff]  ;;  %v51_v12 = vld [vmem:[%s2864_s4 + $0x18] sm:$0xff]  ;;  %vm187_vm2 = vcmask 261120  }
   0xe   :  { %174 = vperm.xlu1 %2202, %v51_v12   ;;  %v52_v13 = vld [vmem:[%s2866_s6] sm:$0xff]  ;;  %v53_v14 = vld [vmem:[%s2866_s6 + $0x8] sm:$0xff]  ;;  %v54_v15 = vld [vmem:[%s2866_s6 + $0x10] sm:$0xff] }
   0xf   :  { %v55_v16 = vld [vmem:[%s2866_s6 + $0x18] sm:$0xff]  ;;  %v56_v17 = vld [vmem:[%s2866_s6 + $0x20] sm:$0xff]  ;;  %v57_v18 = vld [vmem:[%s2866_s6 + $0x28] sm:$0xff] }
  0x10   :  { %169 = vperm.xlu0 %2201, %v50_v11   ;;  %v58_v19 = vld [vmem:[%s2866_s6 + $0x30] sm:$0xff]  ;;  %v59_v20 = vld [vmem:[%s2866_s6 + $0x38] sm:$0xff]  ;;  %v2356_v21 = vld [vmem:[%s2863_s3] sm:$0xff]  }
  0x11   :  { %1991 = vmatprep.mubr.msk.bf16.mxu1 %vm187_vm2, %v2356_v21  ;;  %v1814_v40 = vld [vmem:[%s2860_s0 + $0x4] sm:$0xf]  ;;  %v2378_v41 = vld [vmem:[%s2863_s3 + $0x8] sm:$0xff]  }
  0x12   :  { %256 = vperm.xlu1 %2202, %v53_v14   ;;  %v405_v42 = vsel %vm98_vm0, %v1814_v40, 0  ;;  %v2393_v43 = vld [vmem:[%s2865_s5] sm:$0xff]   ;;  %v2416_v12 = vld [vmem:[%s2865_s5 + $0x8] sm:$0xff]   ;;  %v2421_v14 = vld [vmem:[%s2865_s5 + $0x10] sm:$0xff]  }
  0x13   :  { %1999 = vmatprep.mubr.msk.bf16.mxu0 %vm187_vm2, %v2393_v43 }
  0x14   :  { %251 = vperm.xlu0 %2201, %v52_v13  }
  0x16   :  { %266 = vperm.xlu1 %2202, %v55_v16   ;;  %v1823_v16 = vld [vmem:[%s2860_s0 + $0x8] sm:$0xf] }
  0x18   :  { %261 = vperm.xlu0 %2201, %v54_v15  }
  0x1a   :  { %276 = vperm.xlu1 %2202, %v57_v18   ;;  %v601_v18 = vsel %vm98_vm0, %v1823_v16, 0 }
  0x1c   :  { %271 = vperm.xlu0 %2201, %v56_v17   ;;  %v2433_v17 = vld [vmem:[%s2865_s5 + $0x18] sm:$0xff]  }
  0x1e   :  { %286 = vperm.xlu1 %2202, %v59_v20  }
  0x20   :  { %281 = vperm.xlu0 %2201, %v58_v19  }
  0x81   :  { %v2360_v22 = vpop.permute.xlu1 %73 }
  0x83   :  { %v2362_v23 = vpop.permute.xlu0 %63 }
  0x85   :  { %v2365_v27 = vpop.permute.xlu1 %78 }
  0x87   :  { %v2368_v30 = vpop.permute.xlu0 %68 }
  0x89   :  { %v2399_v45 = vpop.permute.xlu1 %164 }
  0x8b   :  { %v2397_v44 = vpop.permute.xlu0 %159 }
  0x8d   :  { %v2404_v50 = vpop.permute.xlu1 %174 }
  0x8f   :  { %v2401_v46 = vpop.permute.xlu0 %169 }
  0xd9   :  { %v1985_v24 = vpop.f32.mrb[0].mxu1 }
  0xda   :  { %v145_v25 = vadd.f32 %v1985_v24, %v2360_v22  ;;  %v136_v26 = vpop.f32.mrb[1].mxu1 }
  0xdb   :  { %v137_v28 = vadd.f32 %v136_v26, %v2362_v23  ;;  %v1986_v29 = vpop.f32.mrb[2].mxu1 }
  0xdc   :  { %v148_v31 = vadd.f32 %v1986_v29, %v2365_v27  ;;  %v139_v32 = vpop.f32.mrb[3].mxu1  ;;  %v153_v34 = vmax.f32 %v145_v25, 0.0 }
  0xdd   :  { %v140_v33 = vadd.f32 %v139_v32, %v2368_v30  ;;  %v151_v36 = vmax.f32 %v137_v28, 0.0 }
  0xde   :  { %v154_v35 = vmax.f32 %v148_v31, 0.0 }
  0xdf   :  { %v152_v37 = vmax.f32 %v140_v33, 0.0 }
  0xe0   :  { %v156_v38 = vpack.c.bf16 %v154_v35, %v153_v34 }
  0xe1   :  { %v155_v39 = vpack.c.bf16 %v152_v37, %v151_v36 }
  0xe3   :  { %1987 = vmatprep.subr.bf16.mxu1 %v155_v39 }
  0xe4   :  { %1988 = vmatpush3.bf16.msra.mxu1 %v155_v39 }
  0xe5   :  { %1989 = vmatprep.subr.bf16.mxu1 %v156_v38 }
  0xe8   :  { %1990 = vmatpush3.bf16.msra.mxu1 %v156_v38 }
  0xe9   :  { %2190 = vmatprep.subr.msk.bf16.mxu1 %vm98_vm0, %v1814_v40 }
  0xeb   :  { %1992 = vmatmul.mubr.msk.bf16.vlgmr.msra.gmra.mrb[4].mxu1 %vm187_vm2, %v2378_v41 }
  0xec   :  { %2008 = vmatpush3.bf16.msra.mxu1 %v405_v42  ;;  %2009 = vmatprep.mubr.msk.bf16.mxu1 %vm91_vm1, %v2292_v1 }
  0xf3   :  { %2010 = vmatmul.mubr.msk.bf16.vlgmr.msra.gmra.mrb[8].mxu1 %vm91_vm1, %v2301_v3 }
  0xf4   :  { %2017 = vmatprep.mubr.msk.bf16.mxu1 %vm187_vm2, %v2356_v21 }
 0x1be   :  { %v1993_v47 = vpop.f32.mrb[4].mxu1 }
 0x1bf   :  { %v237_v48 = vadd.f32 %v1993_v47, %v2401_v46  ;;  %v228_v49 = vpop.f32.mrb[5].mxu1 }
 0x1c0   :  { %v229_v51 = vadd.f32 %v228_v49, %v2397_v44  ;;  %v1994_v52 = vpop.f32.mrb[6].mxu1 }
 0x1c1   :  { %v240_v53 = vadd.f32 %v1994_v52, %v2404_v50  ;;  %v231_v54 = vpop.f32.mrb[7].mxu1  ;;  %v245_v56 = vmax.f32 %v237_v48, 0.0 }
 0x1c2   :  { %v232_v55 = vadd.f32 %v231_v54, %v2399_v45  ;;  %v243_v58 = vmax.f32 %v229_v51, 0.0 }
 0x1c3   :  { %v246_v57 = vmax.f32 %v240_v53, 0.0 }
 0x1c4   :  { %v244_v59 = vmax.f32 %v232_v55, 0.0 }
 0x1c5   :  { %v248_v60 = vpack.c.bf16 %v246_v57, %v245_v56 }
 0x1c6   :  { %v2011_v61 = vpop.f32.mrb[8].mxu1  ;;  %v247_v62 = vpack.c.bf16 %v244_v59, %v243_v58 }
 0x1c7   :  { %v450_v63 = vadd.f32 %v2011_v61, %v2360_v22  ;;  %v441_v0 = vpop.f32.mrb[9].mxu1 }
 0x1c8   :  { %v442_v2 = vadd.f32 %v441_v0, %v2362_v23  ;;  %1995 = vmatprep.subr.bf16.mxu0 %v247_v62  ;;  %v2012_v4 = vpop.f32.mrb[10].mxu1 }
 0x1c9   :  { %v453_v5 = vadd.f32 %v2012_v4, %v2365_v27  ;;  %1996 = vmatpush3.bf16.msra.mxu0 %v247_v62  ;;  %v444_v6 = vpop.f32.mrb[11].mxu1  ;;  %v458_v8 = vmax.f32 %v450_v63, 0.0  ;;  %v1832_v4 = vld [vmem:[%s2860_s0 + $0xc] sm:$0xf] }
 0x1ca   :  { %v445_v7 = vadd.f32 %v444_v6, %v2368_v30  ;;  %1997 = vmatprep.subr.bf16.mxu0 %v248_v60  ;;  %v456_v10 = vmax.f32 %v442_v2, 0.0  ;;  %v2486_v6 = vpop.permute.xlu0 %251 }
 0x1cb   :  { %v459_v9 = vmax.f32 %v453_v5, 0.0  ;;  %v797_v5 = vsel %vm98_vm0, %v1832_v4, 0 }
 0x1cc   :  { %v457_v11 = vmax.f32 %v445_v7, 0.0  ;;  %v2488_v7 = vpop.permute.xlu1 %256 }
 0x1cd   :  { %v461_v13 = vpack.c.bf16 %v459_v9, %v458_v8  ;;  %1998 = vmatpush3.bf16.msra.mxu0 %v248_v60 }
 0x1ce   :  { %v460_v15 = vpack.c.bf16 %v457_v11, %v456_v10  ;;  %v2490_v8 = vpop.permute.xlu0 %261 }
 0x1d0   :  { %2000 = vmatmul.mubr.msk.bf16.vlgmr.msra.gmra.mrb[0].mxu0 %vm187_vm2, %v2416_v12  ;;  %2013 = vmatprep.subr.bf16.mxu1 %v460_v15  ;;  %v2492_v9 = vpop.permute.xlu1 %266 }
 0x1d1   :  { %2014 = vmatpush3.bf16.msra.mxu1 %v460_v15  ;;  %2003 = vmatprep.mubr.msk.bf16.mxu0 %vm187_vm2, %v2421_v14 }
 0x1d2   :  { %2015 = vmatprep.subr.bf16.mxu1 %v461_v13  ;;  %v2494_v10 = vpop.permute.xlu0 %271 }
 0x1d5   :  { %2016 = vmatpush3.bf16.msra.mxu1 %v461_v13  ;;  %v2497_v13 = vpop.permute.xlu1 %276 }
 0x1d6   :  { %2191 = vmatprep.subr.msk.bf16.mxu1 %vm98_vm0, %v1823_v16 }
 0x1d8   :  { %2004 = vmatmul.mubr.msk.bf16.gmra.mrb[4].mxu0 %vm187_vm2, %v2433_v17  ;;  %2018 = vmatmul.mubr.msk.bf16.vlgmr.msra.gmra.mrb[12].mxu1 %vm187_vm2, %v2378_v41 }
 0x1d9   :  { %2034 = vmatpush3.bf16.msra.mxu1 %v601_v18  ;;  %2035 = vmatprep.mubr.msk.bf16.mxu1 %vm91_vm1, %v2292_v1 }
 0x1da   :  { %2025 = vmatprep.mubr.msk.bf16.mxu0 %vm187_vm2, %v2393_v43 }
 0x1e0   :  { %2036 = vmatmul.mubr.msk.bf16.vlgmr.msra.gmra.mrb[16].mxu1 %vm91_vm1, %v2301_v3 }
 0x1e1   :  { %2043 = vmatprep.mubr.msk.bf16.mxu1 %vm187_vm2, %v2356_v21 }
 0x2a3   :  { %v2001_v19 = vpop.f32.mrb[0].mxu0 }
 0x2a4   :  { %v355_v20 = vpop.f32.mrb[1].mxu0  ;;  %v364_v11 = vadd.f32 %v2001_v19, %v2490_v8 }
 0x2a5   :  { %v2002_v24 = vpop.f32.mrb[2].mxu0  ;;  %v356_v15 = vadd.f32 %v355_v20, %v2486_v6 }
 0x2a6   :  { %v358_v25 = vpop.f32.mrb[3].mxu0  ;;  %v367_v16 = vadd.f32 %v2002_v24, %v2492_v9 }
 0x2a7   :  { %v359_v18 = vadd.f32 %v358_v25, %v2488_v7 }
 0x2ab   :  { %v2449_v26 = vpop.f32.mrb[4].mxu0  ;;  %v2019_v28 = vpop.f32.mrb[12].mxu1 }
 0x2ac   :  { %v505_v29 = vadd.f32 %v2019_v28, %v2401_v46  ;;  %v2452_v31 = vpop.f32.mrb[5].mxu0  ;;  %v496_v32 = vpop.f32.mrb[13].mxu1  ;;  %v388_v28 = vmax.f32 %v364_v11, 0.0 }
 0x2ad   :  { %v497_v33 = vadd.f32 %v496_v32, %v2397_v44  ;;  %v2455_v34 = vpop.f32.mrb[6].mxu0  ;;  %v2020_v35 = vpop.f32.mrb[14].mxu1  ;;  %v372_v20 = vadd.f32 %v2452_v31, %v2494_v10 }
 0x2ae   :  { %v508_v36 = vadd.f32 %v2020_v35, %v2404_v50  ;;  %v2458_v37 = vpop.f32.mrb[7].mxu0  ;;  %v499_v38 = vpop.f32.mrb[15].mxu1  ;;  %v513_v40 = vmax.f32 %v505_v29, 0.0  ;;  %v386_v29 = vmax.f32 %v356_v15, 0.0  ;;  %v389_v35 = vmax.f32 %v367_v16, 0.0 }
 0x2af   :  { %v500_v39 = vadd.f32 %v499_v38, %v2399_v45  ;;  %v511_v47 = vmax.f32 %v497_v33, 0.0  ;;  %v2502_v33 = vpop.permute.xlu0 %281 }
 0x2b0   :  { %v514_v42 = vmax.f32 %v508_v36, 0.0  ;;  %v387_v36 = vmax.f32 %v359_v18, 0.0  ;;  %v380_v19 = vadd.f32 %v2449_v26, %v2502_v33 }
 0x2b1   :  { %v512_v48 = vmax.f32 %v500_v39, 0.0 }
 0x2b2   :  { %v516_v49 = vpack.c.bf16 %v514_v42, %v513_v40  ;;  %v2505_v40 = vpop.permute.xlu1 %286  ;;  %v396_v42 = vmax.f32 %v388_v28, 0.0  ;;  %v395_v31 = vmax.f32 %v387_v36, 0.0 }
 0x2b3   :  { %v515_v51 = vpack.c.bf16 %v512_v48, %v511_v47  ;;  %v2037_v52 = vpop.f32.mrb[16].mxu1  ;;  %v383_v47 = vadd.f32 %v2455_v34, %v2505_v40 }
 0x2b4   :  { %v646_v53 = vadd.f32 %v2037_v52, %v2360_v22  ;;  %v637_v54 = vpop.f32.mrb[17].mxu1  ;;  %v394_v52 = vmax.f32 %v386_v29, 0.0 }
 0x2b5   :  { %v638_v55 = vadd.f32 %v637_v54, %v2362_v23  ;;  %2021 = vmatprep.subr.bf16.mxu0 %v515_v51  ;;  %v2038_v56 = vpop.f32.mrb[18].mxu1 }
 0x2b6   :  { %v649_v57 = vadd.f32 %v2038_v56, %v2365_v27  ;;  %2022 = vmatpush3.bf16.msra.mxu0 %v515_v51  ;;  %v640_v58 = vpop.f32.mrb[19].mxu1  ;;  %v654_v60 = vmax.f32 %v646_v53, 0.0  ;;  %v375_v53 = vadd.f32 %v2458_v37, %v2497_v13 }
 0x2b7   :  { %v641_v59 = vadd.f32 %v640_v58, %v2368_v30  ;;  %2023 = vmatprep.subr.bf16.mxu0 %v516_v49  ;;  %v652_v62 = vmax.f32 %v638_v55, 0.0  ;;  %v397_v55 = vmax.f32 %v389_v35, 0.0  ;;  %v392_v58 = vmax.f32 %v380_v19, 0.0 }
 0x2b8   :  { %v655_v61 = vmax.f32 %v649_v57, 0.0 }
 0x2b9   :  { %v653_v63 = vmax.f32 %v641_v59, 0.0  ;;  %v390_v59 = vmax.f32 %v372_v20, 0.0  ;;  %v400_v16 = vmax.f32 %v392_v58, 0.0 }
 0x2ba   :  { %v657_v0 = vpack.c.bf16 %v655_v61, %v654_v60  ;;  %2024 = vmatpush3.bf16.msra.mxu0 %v516_v49  ;;  %v393_v61 = vmax.f32 %v383_v47, 0.0 }
 0x2bb   :  { %v656_v2 = vpack.c.bf16 %v653_v63, %v652_v62  ;;  %v391_v63 = vmax.f32 %v375_v53, 0.0  ;;  %v398_v18 = vmax.f32 %v390_v59, 0.0 }
 0x2bc   :  { %v401_v36 = vmax.f32 %v393_v61, 0.0 }
 0x2bd   :  { %2026 = vmatmul.mubr.msk.bf16.vlgmr.msra.gmra.mrb[8].mxu0 %vm187_vm2, %v2416_v12  ;;  %2039 = vmatprep.subr.bf16.mxu1 %v656_v2 }
 0x2be   :  { %2040 = vmatpush3.bf16.msra.mxu1 %v656_v2  ;;  %2029 = vmatprep.mubr.msk.bf16.mxu0 %vm187_vm2, %v2421_v14 }
 0x2bf   :  { %2041 = vmatprep.subr.bf16.mxu1 %v657_v0 }
 0x2c2   :  { %2042 = vmatpush3.bf16.msra.mxu1 %v657_v0 }
 0x2c3   :  { %2192 = vmatprep.subr.msk.bf16.mxu1 %vm98_vm0, %v1832_v4 }
 0x2c5   :  { %2030 = vmatmul.mubr.msk.bf16.gmra.mrb[12].mxu0 %vm187_vm2, %v2433_v17  ;;  %2044 = vmatmul.mubr.msk.bf16.vlgmr.msra.gmra.mrb[20].mxu1 %vm187_vm2, %v2378_v41 }
 0x2c6   :  { %2060 = vmatpush3.bf16.msra.mxu1 %v797_v5  ;;  %2061 = vmatprep.mubr.msk.bf16.mxu1 %vm91_vm1, %v2292_v1 }
 0x2c7   :  { %2051 = vmatprep.mubr.msk.bf16.mxu0 %vm187_vm2, %v2393_v43 }
 0x2cd   :  { %2062 = vmatmul.mubr.msk.bf16.vlgmr.msra.gmra.mrb[24].mxu1 %vm91_vm1, %v2301_v3 }
 0x2ce   :  { %2069 = vmatprep.mubr.msk.bf16.mxu1 %vm187_vm2, %v2356_v21 }
 0x390   :  { %v2027_v32 = vpop.f32.mrb[8].mxu0 }
 0x391   :  { %v560_v38 = vadd.f32 %v2027_v32, %v2490_v8  ;;  %v551_v39 = vpop.f32.mrb[9].mxu0 }
 0x392   :  { %v552_v24 = vadd.f32 %v551_v39, %v2486_v6  ;;  %v2028_v25 = vpop.f32.mrb[10].mxu0 }
 0x393   :  { %v584_v48 = vmax.f32 %v560_v38, 0.0  ;;  %v563_v49 = vadd.f32 %v2028_v25, %v2492_v9  ;;  %v554_v51 = vpop.f32.mrb[11].mxu0  ;;  %v399_v25 = vmax.f32 %v391_v63, 0.0 }
 0x394   :  { %v582_v54 = vmax.f32 %v552_v24, 0.0  ;;  %v555_v26 = vadd.f32 %v554_v51, %v2488_v7 }
 0x395   :  { %v2518_v56 = vmax.f32 %v396_v42, %v584_v48  ;;  %v585_v57 = vmax.f32 %v563_v49, 0.0 }
 0x396   :  { %v2520_v60 = vmax.f32 %v394_v52, %v582_v54  ;;  %v583_v34 = vmax.f32 %v555_v26, 0.0 }
 0x397   :  { %v2522_v62 = vmax.f32 %v397_v55, %v585_v57 }
 0x398   :  { %v2524_v0 = vmax.f32 %v395_v31, %v583_v34  ;;  %v2031_v37 = vpop.f32.mrb[12].mxu0  ;;  %v2045_v2 = vpop.f32.mrb[20].mxu1 }
 0x399   :  { %v576_v4 = vadd.f32 %v2031_v37, %v2502_v33  ;;  %v701_v5 = vadd.f32 %v2045_v2, %v2401_v46  ;;  %v567_v11 = vpop.f32.mrb[13].mxu0  ;;  %v692_v15 = vpop.f32.mrb[21].mxu1 }
 0x39a   :  { %v568_v28 = vadd.f32 %v567_v11, %v2494_v10  ;;  %v693_v29 = vadd.f32 %v692_v15, %v2397_v44  ;;  %v2032_v32 = vpop.f32.mrb[14].mxu0  ;;  %v2046_v35 = vpop.f32.mrb[22].mxu1 }
 0x39b   :  { %v588_v38 = vmax.f32 %v576_v4, 0.0  ;;  %v579_v39 = vadd.f32 %v2032_v32, %v2505_v40  ;;  %v704_v19 = vadd.f32 %v2046_v35, %v2404_v50  ;;  %v570_v20 = vpop.f32.mrb[15].mxu0  ;;  %v695_v24 = vpop.f32.mrb[23].mxu1  ;;  %v709_v51 = vmax.f32 %v701_v5, 0.0 }
 0x39c   :  { %v586_v42 = vmax.f32 %v568_v28, 0.0  ;;  %v571_v47 = vadd.f32 %v570_v20, %v2497_v13  ;;  %v696_v48 = vadd.f32 %v695_v24, %v2399_v45  ;;  %v707_v26 = vmax.f32 %v693_v29, 0.0 }
 0x39d   :  { %v2534_v49 = vmax.f32 %v400_v16, %v588_v38  ;;  %v589_v52 = vmax.f32 %v579_v39, 0.0  ;;  %v710_v53 = vmax.f32 %v704_v19, 0.0 }
 0x39e   :  { %v2536_v54 = vmax.f32 %v398_v18, %v586_v42  ;;  %v587_v55 = vmax.f32 %v571_v47, 0.0  ;;  %v708_v31 = vmax.f32 %v696_v48, 0.0 }
 0x39f   :  { %v2538_v57 = vmax.f32 %v401_v36, %v589_v52  ;;  %v712_v58 = vpack.c.bf16 %v710_v53, %v709_v51  ;;  %v1841_v36 = vld [vmem:[%s2860_s0 + $0x10] sm:$0xf] }
 0x3a0   :  { %v2540_v59 = vmax.f32 %v399_v25, %v587_v55  ;;  %v711_v34 = vpack.c.bf16 %v708_v31, %v707_v26  ;;  %v2063_v61 = vpop.f32.mrb[24].mxu1  ;;  %v993_v38 = vsel %vm98_vm0, %v1841_v36, 0 }
 0x3a1   :  { %v842_v63 = vadd.f32 %v2063_v61, %v2360_v22  ;;  %v833_v37 = vpop.f32.mrb[25].mxu1 }
 0x3a2   :  { %v834_v2 = vadd.f32 %v833_v37, %v2362_v23  ;;  %2047 = vmatprep.subr.bf16.mxu0 %v711_v34  ;;  %v2064_v4 = vpop.f32.mrb[26].mxu1 }
 0x3a3   :  { %v845_v5 = vadd.f32 %v2064_v4, %v2365_v27  ;;  %2048 = vmatpush3.bf16.msra.mxu0 %v711_v34  ;;  %v836_v11 = vpop.f32.mrb[27].mxu1  ;;  %v850_v16 = vmax.f32 %v842_v63, 0.0 }
 0x3a4   :  { %v837_v15 = vadd.f32 %v836_v11, %v2368_v30  ;;  %2049 = vmatprep.subr.bf16.mxu0 %v712_v58  ;;  %v848_v28 = vmax.f32 %v834_v2, 0.0 }
 0x3a5   :  { %v851_v18 = vmax.f32 %v845_v5, 0.0 }
 0x3a6   :  { %v849_v29 = vmax.f32 %v837_v15, 0.0 }
 0x3a7   :  { %v853_v32 = vpack.c.bf16 %v851_v18, %v850_v16  ;;  %2050 = vmatpush3.bf16.msra.mxu0 %v712_v58 }
 0x3a8   :  { %v852_v35 = vpack.c.bf16 %v849_v29, %v848_v28 }
 0x3aa   :  { %2052 = vmatmul.mubr.msk.bf16.vlgmr.msra.gmra.mrb[16].mxu0 %vm187_vm2, %v2416_v12  ;;  %2065 = vmatprep.subr.bf16.mxu1 %v852_v35 }
 0x3ab   :  { %2066 = vmatpush3.bf16.msra.mxu1 %v852_v35  ;;  %2055 = vmatprep.mubr.msk.bf16.mxu0 %vm187_vm2, %v2421_v14 }
 0x3ac   :  { %2067 = vmatprep.subr.bf16.mxu1 %v853_v32 }
 0x3af   :  { %2068 = vmatpush3.bf16.msra.mxu1 %v853_v32 }
 0x3b0   :  { %2193 = vmatprep.subr.msk.bf16.mxu1 %vm98_vm0, %v1841_v36 }
 0x3b2   :  { %2056 = vmatmul.mubr.msk.bf16.gmra.mrb[20].mxu0 %vm187_vm2, %v2433_v17  ;;  %2070 = vmatmul.mubr.msk.bf16.vlgmr.msra.gmra.mrb[28].mxu1 %vm187_vm2, %v2378_v41 }
 0x3b3   :  { %2086 = vmatpush3.bf16.msra.mxu1 %v993_v38  ;;  %2087 = vmatprep.mubr.msk.bf16.mxu1 %vm91_vm1, %v2292_v1 }
 0x3b4   :  { %2077 = vmatprep.mubr.msk.bf16.mxu0 %vm187_vm2, %v2393_v43 }
 0x3ba   :  { %2088 = vmatmul.mubr.msk.bf16.vlgmr.msra.gmra.mrb[32].mxu1 %vm91_vm1, %v2301_v3 }
 0x3bb   :  { %2095 = vmatprep.mubr.msk.bf16.mxu1 %vm187_vm2, %v2356_v21 }
 0x47d   :  { %v2053_v39 = vpop.f32.mrb[16].mxu0 }
 0x47e   :  { %v756_v19 = vadd.f32 %v2053_v39, %v2490_v8  ;;  %v747_v20 = vpop.f32.mrb[17].mxu0 }
 0x47f   :  { %v748_v24 = vadd.f32 %v747_v20, %v2486_v6  ;;  %v2054_v25 = vpop.f32.mrb[18].mxu0 }
 0x480   :  { %v780_v42 = vmax.f32 %v756_v19, 0.0  ;;  %v759_v47 = vadd.f32 %v2054_v25, %v2492_v9  ;;  %v750_v48 = vpop.f32.mrb[19].mxu0 }
 0x481   :  { %v778_v51 = vmax.f32 %v748_v24, 0.0  ;;  %v751_v52 = vadd.f32 %v750_v48, %v2488_v7 }
 0x482   :  { %v2572_v53 = vmax.f32 %v2518_v56, %v780_v42  ;;  %v781_v26 = vmax.f32 %v759_v47, 0.0 }
 0x483   :  { %v2575_v55 = vmax.f32 %v2520_v60, %v778_v51  ;;  %v779_v31 = vmax.f32 %v751_v52, 0.0 }
 0x484   :  { %v2578_v58 = vmax.f32 %v2522_v62, %v781_v26 }
 0x485   :  { %v2581_v34 = vmax.f32 %v2524_v0, %v779_v31  ;;  %v2057_v61 = vpop.f32.mrb[20].mxu0  ;;  %v2071_v63 = vpop.f32.mrb[28].mxu1 }
 0x486   :  { %v772_v37 = vadd.f32 %v2057_v61, %v2502_v33  ;;  %v897_v2 = vadd.f32 %v2071_v63, %v2401_v46  ;;  %v763_v4 = vpop.f32.mrb[21].mxu0  ;;  %v888_v56 = vpop.f32.mrb[29].mxu1 }
 0x487   :  { %v764_v5 = vadd.f32 %v763_v4, %v2494_v10  ;;  %v889_v60 = vadd.f32 %v888_v56, %v2397_v44  ;;  %v2058_v11 = vpop.f32.mrb[22].mxu0  ;;  %v2072_v15 = vpop.f32.mrb[30].mxu1 }
 0x488   :  { %v784_v16 = vmax.f32 %v772_v37, 0.0  ;;  %v775_v62 = vadd.f32 %v2058_v11, %v2505_v40  ;;  %v900_v0 = vadd.f32 %v2072_v15, %v2404_v50  ;;  %v766_v18 = vpop.f32.mrb[23].mxu0  ;;  %v891_v28 = vpop.f32.mrb[31].mxu1  ;;  %v905_v38 = vmax.f32 %v897_v2, 0.0  ;;  %v1850_v11 = vld [vmem:[%s2860_s0 + $0x14] sm:$0xf] }
 0x489   :  { %v782_v29 = vmax.f32 %v764_v5, 0.0  ;;  %v767_v32 = vadd.f32 %v766_v18, %v2497_v13  ;;  %v892_v35 = vadd.f32 %v891_v28, %v2399_v45  ;;  %v903_v24 = vmax.f32 %v889_v60, 0.0 }
 0x48a   :  { %v2592_v36 = vmax.f32 %v2534_v49, %v784_v16  ;;  %v785_v39 = vmax.f32 %v775_v62, 0.0  ;;  %v906_v19 = vmax.f32 %v900_v0, 0.0  ;;  %v1189_v15 = vsel %vm98_vm0, %v1850_v11, 0 }
 0x48b   :  { %v2595_v20 = vmax.f32 %v2536_v54, %v782_v29  ;;  %v783_v25 = vmax.f32 %v767_v32, 0.0  ;;  %v904_v42 = vmax.f32 %v892_v35, 0.0 }
 0x48c   :  { %v2598_v47 = vmax.f32 %v2538_v57, %v785_v39  ;;  %v908_v48 = vpack.c.bf16 %v906_v19, %v905_v38 }
 0x48d   :  { %v2601_v51 = vmax.f32 %v2540_v59, %v783_v25  ;;  %v907_v52 = vpack.c.bf16 %v904_v42, %v903_v24  ;;  %v2089_v26 = vpop.f32.mrb[32].mxu1 }
 0x48e   :  { %v1038_v49 = vadd.f32 %v2089_v26, %v2360_v22  ;;  %v1029_v31 = vpop.f32.mrb[33].mxu1 }
 0x48f   :  { %v1030_v61 = vadd.f32 %v1029_v31, %v2362_v23  ;;  %2073 = vmatprep.subr.bf16.mxu0 %v907_v52  ;;  %v2090_v54 = vpop.f32.mrb[34].mxu1 }
 0x490   :  { %v1041_v63 = vadd.f32 %v2090_v54, %v2365_v27  ;;  %2074 = vmatpush3.bf16.msra.mxu0 %v907_v52  ;;  %v1032_v37 = vpop.f32.mrb[35].mxu1  ;;  %v1046_v2 = vmax.f32 %v1038_v49, 0.0 }
 0x491   :  { %v1033_v57 = vadd.f32 %v1032_v37, %v2368_v30  ;;  %2075 = vmatprep.subr.bf16.mxu0 %v908_v48  ;;  %v1044_v59 = vmax.f32 %v1030_v61, 0.0 }
 0x492   :  { %v1047_v4 = vmax.f32 %v1041_v63, 0.0 }
 0x493   :  { %v1045_v56 = vmax.f32 %v1033_v57, 0.0 }
 0x494   :  { %v1049_v5 = vpack.c.bf16 %v1047_v4, %v1046_v2  ;;  %2076 = vmatpush3.bf16.msra.mxu0 %v908_v48 }
 0x495   :  { %v1048_v60 = vpack.c.bf16 %v1045_v56, %v1044_v59 }
 0x497   :  { %2078 = vmatmul.mubr.msk.bf16.vlgmr.msra.gmra.mrb[24].mxu0 %vm187_vm2, %v2416_v12  ;;  %2091 = vmatprep.subr.bf16.mxu1 %v1048_v60 }
 0x498   :  { %2092 = vmatpush3.bf16.msra.mxu1 %v1048_v60  ;;  %2081 = vmatprep.mubr.msk.bf16.mxu0 %vm187_vm2, %v2421_v14 }
 0x499   :  { %2093 = vmatprep.subr.bf16.mxu1 %v1049_v5 }
 0x49c   :  { %2094 = vmatpush3.bf16.msra.mxu1 %v1049_v5 }
 0x49d   :  { %2194 = vmatprep.subr.msk.bf16.mxu1 %vm98_vm0, %v1850_v11 }
 0x49f   :  { %2082 = vmatmul.mubr.msk.bf16.gmra.mrb[28].mxu0 %vm187_vm2, %v2433_v17  ;;  %2096 = vmatmul.mubr.msk.bf16.vlgmr.msra.gmra.mrb[36].mxu1 %vm187_vm2, %v2378_v41 }
 0x4a0   :  { %2112 = vmatpush3.bf16.msra.mxu1 %v1189_v15  ;;  %2113 = vmatprep.mubr.msk.bf16.mxu1 %vm91_vm1, %v2292_v1 }
 0x4a1   :  { %2103 = vmatprep.mubr.msk.bf16.mxu0 %vm187_vm2, %v2393_v43 }
 0x4a7   :  { %2114 = vmatmul.mubr.msk.bf16.vlgmr.msra.gmra.mrb[40].mxu1 %vm91_vm1, %v2301_v3 }
 0x4a8   :  { %2121 = vmatprep.mubr.msk.bf16.mxu1 %vm187_vm2, %v2356_v21 }
 0x56a   :  { %v2079_v16 = vpop.f32.mrb[24].mxu0 }
 0x56b   :  { %v952_v62 = vadd.f32 %v2079_v16, %v2490_v8  ;;  %v943_v0 = vpop.f32.mrb[25].mxu0 }
 0x56c   :  { %v944_v18 = vadd.f32 %v943_v0, %v2486_v6  ;;  %v2080_v28 = vpop.f32.mrb[26].mxu0 }
 0x56d   :  { %v976_v29 = vmax.f32 %v952_v62, 0.0  ;;  %v955_v32 = vadd.f32 %v2080_v28, %v2492_v9  ;;  %v946_v35 = vpop.f32.mrb[27].mxu0 }
 0x56e   :  { %v974_v38 = vmax.f32 %v944_v18, 0.0  ;;  %v947_v39 = vadd.f32 %v946_v35, %v2488_v7 }
 0x56f   :  { %v2633_v19 = vmax.f32 %v2572_v53, %v976_v29  ;;  %v977_v24 = vmax.f32 %v955_v32, 0.0 }
 0x570   :  { %v2636_v25 = vmax.f32 %v2575_v55, %v974_v38  ;;  %v975_v42 = vmax.f32 %v947_v39, 0.0 }
 0x571   :  { %v2639_v48 = vmax.f32 %v2578_v58, %v977_v24 }
 0x572   :  { %v2642_v52 = vmax.f32 %v2581_v34, %v975_v42  ;;  %v2083_v26 = vpop.f32.mrb[28].mxu0  ;;  %v2097_v49 = vpop.f32.mrb[36].mxu1 }
 0x573   :  { %v968_v31 = vadd.f32 %v2083_v26, %v2502_v33  ;;  %v1093_v61 = vadd.f32 %v2097_v49, %v2401_v46  ;;  %v959_v54 = vpop.f32.mrb[29].mxu0  ;;  %v1084_v53 = vpop.f32.mrb[37].mxu1 }
 0x574   :  { %v960_v63 = vadd.f32 %v959_v54, %v2494_v10  ;;  %v1085_v55 = vadd.f32 %v1084_v53, %v2397_v44  ;;  %v2084_v37 = vpop.f32.mrb[30].mxu0  ;;  %v2098_v57 = vpop.f32.mrb[38].mxu1 }
 0x575   :  { %v980_v2 = vmax.f32 %v968_v31, 0.0  ;;  %v971_v58 = vadd.f32 %v2084_v37, %v2505_v40  ;;  %v1096_v34 = vadd.f32 %v2098_v57, %v2404_v50  ;;  %v962_v4 = vpop.f32.mrb[31].mxu0  ;;  %v1087_v59 = vpop.f32.mrb[39].mxu1  ;;  %v1101_v15 = vmax.f32 %v1093_v61, 0.0  ;;  %v1859_v37 = vld [vmem:[%s2860_s0 + $0x18] sm:$0xf] }
 0x576   :  { %v978_v56 = vmax.f32 %v960_v63, 0.0  ;;  %v963_v5 = vadd.f32 %v962_v4, %v2497_v13  ;;  %v1088_v60 = vadd.f32 %v1087_v59, %v2399_v45  ;;  %v1099_v18 = vmax.f32 %v1085_v55, 0.0 }
 0x577   :  { %v2653_v11 = vmax.f32 %v2592_v36, %v980_v2  ;;  %v981_v16 = vmax.f32 %v971_v58, 0.0  ;;  %v1102_v62 = vmax.f32 %v1096_v34, 0.0  ;;  %v1385_v57 = vsel %vm98_vm0, %v1859_v37, 0 }
 0x578   :  { %v2656_v0 = vmax.f32 %v2595_v20, %v978_v56  ;;  %v979_v28 = vmax.f32 %v963_v5, 0.0  ;;  %v1100_v29 = vmax.f32 %v1088_v60, 0.0 }
 0x579   :  { %v2659_v32 = vmax.f32 %v2598_v47, %v981_v16  ;;  %v1104_v35 = vpack.c.bf16 %v1102_v62, %v1101_v15 }
 0x57a   :  { %v2662_v38 = vmax.f32 %v2601_v51, %v979_v28  ;;  %v1103_v39 = vpack.c.bf16 %v1100_v29, %v1099_v18  ;;  %v2115_v24 = vpop.f32.mrb[40].mxu1 }
 0x57b   :  { %v1234_v36 = vadd.f32 %v2115_v24, %v2360_v22  ;;  %v1225_v42 = vpop.f32.mrb[41].mxu1 }
 0x57c   :  { %v1226_v26 = vadd.f32 %v1225_v42, %v2362_v23  ;;  %2099 = vmatprep.subr.bf16.mxu0 %v1103_v39  ;;  %v2116_v20 = vpop.f32.mrb[42].mxu1 }
 0x57d   :  { %v1237_v49 = vadd.f32 %v2116_v20, %v2365_v27  ;;  %2100 = vmatpush3.bf16.msra.mxu0 %v1103_v39  ;;  %v1228_v31 = vpop.f32.mrb[43].mxu1  ;;  %v1242_v61 = vmax.f32 %v1234_v36, 0.0 }
 0x57e   :  { %v1229_v47 = vadd.f32 %v1228_v31, %v2368_v30  ;;  %2101 = vmatprep.subr.bf16.mxu0 %v1104_v35  ;;  %v1240_v51 = vmax.f32 %v1226_v26, 0.0 }
 0x57f   :  { %v1243_v54 = vmax.f32 %v1237_v49, 0.0 }
 0x580   :  { %v1241_v53 = vmax.f32 %v1229_v47, 0.0 }
 0x581   :  { %v1245_v63 = vpack.c.bf16 %v1243_v54, %v1242_v61  ;;  %2102 = vmatpush3.bf16.msra.mxu0 %v1104_v35 }
 0x582   :  { %v1244_v55 = vpack.c.bf16 %v1241_v53, %v1240_v51 }
 0x584   :  { %2104 = vmatmul.mubr.msk.bf16.vlgmr.msra.gmra.mrb[32].mxu0 %vm187_vm2, %v2416_v12  ;;  %2117 = vmatprep.subr.bf16.mxu1 %v1244_v55 }
 0x585   :  { %2118 = vmatpush3.bf16.msra.mxu1 %v1244_v55  ;;  %2107 = vmatprep.mubr.msk.bf16.mxu0 %vm187_vm2, %v2421_v14 }
 0x586   :  { %2119 = vmatprep.subr.bf16.mxu1 %v1245_v63 }
 0x589   :  { %2120 = vmatpush3.bf16.msra.mxu1 %v1245_v63 }
 0x58a   :  { %2195 = vmatprep.subr.msk.bf16.mxu1 %vm98_vm0, %v1859_v37 }
 0x58c   :  { %2108 = vmatmul.mubr.msk.bf16.gmra.mrb[36].mxu0 %vm187_vm2, %v2433_v17  ;;  %2122 = vmatmul.mubr.msk.bf16.vlgmr.msra.gmra.mrb[44].mxu1 %vm187_vm2, %v2378_v41 }
 0x58d   :  { %2138 = vmatpush3.bf16.msra.mxu1 %v1385_v57  ;;  %2139 = vmatprep.mubr.msk.bf16.mxu1 %vm91_vm1, %v2292_v1 }
 0x58e   :  { %2129 = vmatprep.mubr.msk.bf16.mxu0 %vm187_vm2, %v2393_v43 }
 0x594   :  { %2140 = vmatmul.mubr.msk.bf16.vlgmr.msra.gmra.mrb[48].mxu1 %vm91_vm1, %v2301_v3 }
 0x595   :  { %2147 = vmatprep.mubr.msk.bf16.mxu1 %vm187_vm2, %v2356_v21 }
 0x657   :  { %v2105_v2 = vpop.f32.mrb[32].mxu0 }
 0x658   :  { %v1148_v58 = vadd.f32 %v2105_v2, %v2490_v8  ;;  %v1139_v34 = vpop.f32.mrb[33].mxu0 }
 0x659   :  { %v1140_v4 = vadd.f32 %v1139_v34, %v2486_v6  ;;  %v2106_v59 = vpop.f32.mrb[34].mxu0 }
 0x65a   :  { %v1172_v56 = vmax.f32 %v1148_v58, 0.0  ;;  %v1151_v5 = vadd.f32 %v2106_v59, %v2492_v9  ;;  %v1142_v1 = vpop.f32.mrb[35].mxu0 }
 0x65b   :  { %v1170_v60 = vmax.f32 %v1140_v4, 0.0  ;;  %v1143_v15 = vadd.f32 %v1142_v1, %v2488_v7 }
 0x65c   :  { %v2694_v16 = vmax.f32 %v2633_v19, %v1172_v56  ;;  %v1173_v3 = vmax.f32 %v1151_v5, 0.0 }
 0x65d   :  { %v2697_v62 = vmax.f32 %v2636_v25, %v1170_v60  ;;  %v1171_v18 = vmax.f32 %v1143_v15, 0.0 }
 0x65e   :  { %v2700_v28 = vmax.f32 %v2639_v48, %v1173_v3 }
 0x65f   :  { %v2703_v29 = vmax.f32 %v2642_v52, %v1171_v18  ;;  %v2109_v35 = vpop.f32.mrb[36].mxu0  ;;  %v2123_v39 = vpop.f32.mrb[44].mxu1 }
 0x660   :  { %v1164_v24 = vadd.f32 %v2109_v35, %v2502_v33  ;;  %v1289_v36 = vadd.f32 %v2123_v39, %v2401_v46  ;;  %v1155_v42 = vpop.f32.mrb[37].mxu0  ;;  %v1280_v19 = vpop.f32.mrb[45].mxu1 }
 0x661   :  { %v1156_v26 = vadd.f32 %v1155_v42, %v2494_v10  ;;  %v1281_v25 = vadd.f32 %v1280_v19, %v2397_v44  ;;  %v2110_v20 = vpop.f32.mrb[38].mxu0  ;;  %v2124_v49 = vpop.f32.mrb[46].mxu1 }
 0x662   :  { %v1176_v31 = vmax.f32 %v1164_v24, 0.0  ;;  %v1167_v48 = vadd.f32 %v2110_v20, %v2505_v40  ;;  %v1292_v52 = vadd.f32 %v2124_v49, %v2404_v50  ;;  %v1158_v47 = vpop.f32.mrb[39].mxu0  ;;  %v1283_v61 = vpop.f32.mrb[47].mxu1  ;;  %v1297_v55 = vmax.f32 %v1289_v36, 0.0  ;;  %v2211_v20 = vld [vmem:[%s2861_s1] sm:$0xff]   ;;  %v2212_v49 = vld [vmem:[%s2861_s1 + $0x8] sm:$0xff]  }
 0x663   :  { %v1174_v54 = vmax.f32 %v1156_v26, 0.0  ;;  %v1159_v51 = vadd.f32 %v1158_v47, %v2497_v13  ;;  %v1284_v53 = vadd.f32 %v1283_v61, %v2399_v45  ;;  %v1295_v58 = vmax.f32 %v1281_v25, 0.0  ;;  %v1868_v26 = vld [vmem:[%s2860_s0 + $0x1c] sm:$0xf] }
 0x664   :  { %v2714_v63 = vmax.f32 %v2653_v11, %v1176_v31  ;;  %v1177_v37 = vmax.f32 %v1167_v48, 0.0  ;;  %v1298_v57 = vmax.f32 %v1292_v52, 0.0  ;;  %v1581_v25 = vsel %vm98_vm0, %v1868_v26, 0 }
 0x665   :  { %v2717_v2 = vmax.f32 %v2656_v0, %v1174_v54  ;;  %v1175_v34 = vmax.f32 %v1159_v51, 0.0  ;;  %v1296_v4 = vmax.f32 %v1284_v53, 0.0 }
 0x666   :  { %v2720_v59 = vmax.f32 %v2659_v32, %v1177_v37  ;;  %v1300_v56 = vpack.c.bf16 %v1298_v57, %v1297_v55 }
 0x667   :  { %v2723_v5 = vmax.f32 %v2662_v38, %v1175_v34  ;;  %v1299_v1 = vpack.c.bf16 %v1296_v4, %v1295_v58  ;;  %v2141_v60 = vpop.f32.mrb[48].mxu1 }
 0x668   :  { %v1430_v11 = vadd.f32 %v2141_v60, %v2360_v22  ;;  %v1421_v15 = vpop.f32.mrb[49].mxu1 }
 0x669   :  { %v1422_v3 = vadd.f32 %v1421_v15, %v2362_v23  ;;  %2125 = vmatprep.subr.bf16.mxu0 %v1299_v1  ;;  %v2142_v0 = vpop.f32.mrb[50].mxu1 }
 0x66a   :  { %v1433_v18 = vadd.f32 %v2142_v0, %v2365_v27  ;;  %2126 = vmatpush3.bf16.msra.mxu0 %v1299_v1  ;;  %v1424_v35 = vpop.f32.mrb[51].mxu1  ;;  %v1438_v39 = vmax.f32 %v1430_v11, 0.0 }
 0x66b   :  { %v1425_v32 = vadd.f32 %v1424_v35, %v2368_v30  ;;  %2127 = vmatprep.subr.bf16.mxu0 %v1300_v56  ;;  %v1436_v38 = vmax.f32 %v1422_v3, 0.0 }
 0x66c   :  { %v1439_v24 = vmax.f32 %v1433_v18, 0.0 }
 0x66d   :  { %v1437_v36 = vmax.f32 %v1425_v32, 0.0 }
 0x66e   :  { %v1441_v42 = vpack.c.bf16 %v1439_v24, %v1438_v39  ;;  %2128 = vmatpush3.bf16.msra.mxu0 %v1300_v56 }
 0x66f   :  { %v1440_v19 = vpack.c.bf16 %v1437_v36, %v1436_v38 }
 0x671   :  { %2130 = vmatmul.mubr.msk.bf16.vlgmr.msra.gmra.mrb[40].mxu0 %vm187_vm2, %v2416_v12  ;;  %2143 = vmatprep.subr.bf16.mxu1 %v1440_v19 }
 0x672   :  { %2144 = vmatpush3.bf16.msra.mxu1 %v1440_v19  ;;  %2133 = vmatprep.mubr.msk.bf16.mxu0 %vm187_vm2, %v2421_v14 }
 0x673   :  { %2145 = vmatprep.subr.bf16.mxu1 %v1441_v42 }
 0x676   :  { %2146 = vmatpush3.bf16.msra.mxu1 %v1441_v42 }
 0x677   :  { %2196 = vmatprep.subr.msk.bf16.mxu1 %vm98_vm0, %v1868_v26 }
 0x679   :  { %2134 = vmatmul.mubr.msk.bf16.gmra.mrb[44].mxu0 %vm187_vm2, %v2433_v17  ;;  %2148 = vmatmul.mubr.msk.bf16.vlgmr.msra.gmra.mrb[52].mxu1 %vm187_vm2, %v2378_v41 }
 0x67a   :  { %2164 = vmatpush3.bf16.msra.mxu1 %v1581_v25  ;;  %2165 = vmatprep.mubr.msk.bf16.mxu1 %vm91_vm1, %v2211_v20 }
 0x67b   :  { %2155 = vmatprep.mubr.msk.bf16.mxu0 %vm187_vm2, %v2393_v43 }
 0x681   :  { %2166 = vmatmul.mubr.msk.bf16.vlgmr.msra.gmra.mrb[56].mxu1 %vm91_vm1, %v2212_v49 }
 0x682   :  { %2173 = vmatprep.mubr.msk.bf16.mxu1 %vm187_vm2, %v2356_v21 }
 0x744   :  { %v2131_v41 = vpop.f32.mrb[40].mxu0 }
 0x745   :  { %v1344_v31 = vadd.f32 %v2131_v41, %v2490_v8  ;;  %v1335_v48 = vpop.f32.mrb[41].mxu0 }
 0x746   :  { %v1336_v52 = vadd.f32 %v1335_v48, %v2486_v6  ;;  %v2132_v47 = vpop.f32.mrb[42].mxu0 }
 0x747   :  { %v1368_v61 = vmax.f32 %v1344_v31, 0.0  ;;  %v1347_v54 = vadd.f32 %v2132_v47, %v2492_v9  ;;  %v1338_v43 = vpop.f32.mrb[43].mxu0 }
 0x748   :  { %v1366_v51 = vmax.f32 %v1336_v52, 0.0  ;;  %v1339_v53 = vadd.f32 %v1338_v43, %v2488_v7 }
 0x749   :  { %v2759_v55 = vmax.f32 %v2694_v16, %v1368_v61  ;;  %v1369_v37 = vmax.f32 %v1347_v54, 0.0 }
 0x74a   :  { %v2762_v21 = vmax.f32 %v2697_v62, %v1366_v51  ;;  %v1367_v57 = vmax.f32 %v1339_v53, 0.0 }
 0x74b   :  { %v2765_v58 = vmax.f32 %v2700_v28, %v1369_v37 }
 0x74c   :  { %v2768_v34 = vmax.f32 %v2703_v29, %v1367_v57  ;;  %v2135_v4 = vpop.f32.mrb[44].mxu0  ;;  %v2149_v56 = vpop.f32.mrb[52].mxu1 }
 0x74d   :  { %v1360_v1 = vadd.f32 %v2135_v4, %v2502_v33  ;;  %v1485_v60 = vadd.f32 %v2149_v56, %v2401_v46  ;;  %v1351_v11 = vpop.f32.mrb[45].mxu0  ;;  %v1476_v16 = vpop.f32.mrb[53].mxu1 }
 0x74e   :  { %v1352_v15 = vadd.f32 %v1351_v11, %v2494_v10  ;;  %v1477_v62 = vadd.f32 %v1476_v16, %v2397_v44  ;;  %v2136_v3 = vpop.f32.mrb[46].mxu0  ;;  %v2150_v0 = vpop.f32.mrb[54].mxu1 }
 0x74f   :  { %v1372_v18 = vmax.f32 %v1360_v1, 0.0  ;;  %v1363_v28 = vadd.f32 %v2136_v3, %v2505_v40  ;;  %v1488_v29 = vadd.f32 %v2150_v0, %v2404_v50  ;;  %v1354_v35 = vpop.f32.mrb[47].mxu0  ;;  %v1479_v32 = vpop.f32.mrb[55].mxu1  ;;  %v1493_v42 = vmax.f32 %v1485_v60, 0.0 }
 0x750   :  { %v1370_v39 = vmax.f32 %v1352_v15, 0.0  ;;  %v1355_v24 = vadd.f32 %v1354_v35, %v2497_v13  ;;  %v1480_v38 = vadd.f32 %v1479_v32, %v2399_v45  ;;  %v1491_v20 = vmax.f32 %v1477_v62, 0.0 }
 0x751   :  { %v2779_v36 = vmax.f32 %v2714_v63, %v1372_v18  ;;  %v1373_v19 = vmax.f32 %v1363_v28, 0.0  ;;  %v1494_v26 = vmax.f32 %v1488_v29, 0.0 }
 0x752   :  { %v2782_v25 = vmax.f32 %v2717_v2, %v1370_v39  ;;  %v1371_v49 = vmax.f32 %v1355_v24, 0.0  ;;  %v1492_v41 = vmax.f32 %v1480_v38, 0.0 }
 0x753   :  { %v2785_v31 = vmax.f32 %v2720_v59, %v1373_v19  ;;  %v1496_v48 = vpack.c.bf16 %v1494_v26, %v1493_v42 }
 0x754   :  { %v2788_v52 = vmax.f32 %v2723_v5, %v1371_v49  ;;  %v1495_v47 = vpack.c.bf16 %v1492_v41, %v1491_v20  ;;  %v2167_v61 = vpop.f32.mrb[56].mxu1 }
 0x755   :  { %v1626_v63 = vadd.f32 %v2167_v61, %v2360_v22  ;;  %v1617_v54 = vpop.f32.mrb[57].mxu1  ;;  %v2213_v22 = vld [vmem:[%s2863_s3 + $0x8] sm:$0xff]  }
 0x756   :  { %v1618_v43 = vadd.f32 %v1617_v54, %v2362_v23  ;;  %2151 = vmatprep.subr.bf16.mxu0 %v1495_v47  ;;  %v2168_v2 = vpop.f32.mrb[58].mxu1  ;;  %v2214_v23 = vld [vmem:[%s2865_s5] sm:$0xff]  }
 0x757   :  { %v1629_v51 = vadd.f32 %v2168_v2, %v2365_v27  ;;  %2152 = vmatpush3.bf16.msra.mxu0 %v1495_v47  ;;  %v1620_v53 = vpop.f32.mrb[59].mxu1  ;;  %v1634_v37 = vmax.f32 %v1626_v63, 0.0 }
 0x758   :  { %v1621_v59 = vadd.f32 %v1620_v53, %v2368_v30  ;;  %2153 = vmatprep.subr.bf16.mxu0 %v1496_v48  ;;  %v1632_v5 = vmax.f32 %v1618_v43, 0.0 }
 0x759   :  { %v1635_v57 = vmax.f32 %v1629_v51, 0.0 }
 0x75a   :  { %v1633_v4 = vmax.f32 %v1621_v59, 0.0 }
 0x75b   :  { %v1637_v56 = vpack.c.bf16 %v1635_v57, %v1634_v37  ;;  %2154 = vmatpush3.bf16.msra.mxu0 %v1496_v48 }
 0x75c   :  { %v1636_v1 = vpack.c.bf16 %v1633_v4, %v1632_v5 }
 0x75e   :  { %2156 = vmatmul.mubr.msk.bf16.vlgmr.msra.gmra.mrb[48].mxu0 %vm187_vm2, %v2416_v12  ;;  %2169 = vmatprep.subr.bf16.mxu1 %v1636_v1 }
 0x75f   :  { %2170 = vmatpush3.bf16.msra.mxu1 %v1636_v1  ;;  %2159 = vmatprep.mubr.msk.bf16.mxu0 %vm187_vm2, %v2421_v14 }
 0x760   :  { %2171 = vmatprep.subr.bf16.mxu1 %v1637_v56 }
 0x763   :  { %2172 = vmatpush3.bf16.msra.mxu1 %v1637_v56 }
 0x766   :  { %2160 = vmatmul.mubr.msk.bf16.gmra.mrb[52].mxu0 %vm187_vm2, %v2433_v17  ;;  %2174 = vmatmul.mubr.msk.bf16.vlgmr.msra.gmra.mrb[60].mxu1 %vm187_vm2, %v2213_v22 }
 0x767   :  { %2181 = vmatprep.mubr.msk.bf16.mxu0 %vm187_vm2, %v2214_v23 }
 0x831   :  { %v2157_v27 = vpop.f32.mrb[48].mxu0 }
 0x832   :  { %v1540_v30 = vadd.f32 %v2157_v27, %v2490_v8  ;;  %v1531_v12 = vpop.f32.mrb[49].mxu0 }
 0x833   :  { %v1532_v14 = vadd.f32 %v1531_v12, %v2486_v6  ;;  %v2158_v60 = vpop.f32.mrb[50].mxu0 }
 0x834   :  { %v1564_v17 = vmax.f32 %v1540_v30, 0.0  ;;  %v1543_v11 = vadd.f32 %v2158_v60, %v2492_v9  ;;  %v1534_v16 = vpop.f32.mrb[51].mxu0 }
 0x835   :  { %v1562_v15 = vmax.f32 %v1532_v14, 0.0  ;;  %v1535_v62 = vadd.f32 %v1534_v16, %v2488_v7 }
 0x836   :  { %v1572_v3 = vmax.f32 %v2759_v55, %v1564_v17  ;;  %v1565_v0 = vmax.f32 %v1543_v11, 0.0 }
 0x837   :  { %v1570_v18 = vmax.f32 %v2762_v21, %v1562_v15  ;;  %v1563_v28 = vmax.f32 %v1535_v62, 0.0 }
 0x838   :  { %v1573_v29 = vmax.f32 %v2765_v58, %v1565_v0 }
 0x839   :  { %v1571_v35 = vmax.f32 %v2768_v34, %v1563_v28  ;;  %v2161_v32 = vpop.f32.mrb[52].mxu0  ;;  %v2175_v39 = vpop.f32.mrb[60].mxu1 }
 0x83a   :  { %v1556_v24 = vadd.f32 %v2161_v32, %v2502_v33  ;;  %v1681_v38 = vadd.f32 %v2175_v39, %v2401_v46  ;;  %v1547_v42 = vpop.f32.mrb[53].mxu0  ;;  %v1672_v19 = vpop.f32.mrb[61].mxu1 }
 0x83b   :  { %v1548_v26 = vadd.f32 %v1547_v42, %v2494_v10  ;;  %v1673_v55 = vadd.f32 %v1672_v19, %v2397_v44  ;;  %v2162_v20 = vpop.f32.mrb[54].mxu0  ;;  %v2176_v49 = vpop.f32.mrb[62].mxu1 }
 0x83c   :  { %v1568_v21 = vmax.f32 %v1556_v24, 0.0  ;;  %v1559_v41 = vadd.f32 %v2162_v20, %v2505_v40  ;;  %v1684_v58 = vadd.f32 %v2176_v49, %v2404_v50  ;;  %v1550_v34 = vpop.f32.mrb[55].mxu0  ;;  %v1675_v48 = vpop.f32.mrb[63].mxu1  ;;  %v1689_v54 = vmax.f32 %v1681_v38, 0.0 }
 0x83d   :  { %v1566_v47 = vmax.f32 %v1548_v26, 0.0  ;;  %v1551_v61 = vadd.f32 %v1550_v34, %v2497_v13  ;;  %v1676_v46 = vadd.f32 %v1675_v48, %v2399_v45  ;;  %v1687_v51 = vmax.f32 %v1673_v55, 0.0  ;;  %v2215_v45 = vld [vmem:[%s2865_s5 + $0x8] sm:$0xff]  }
 0x83e   :  { %v1576_v63 = vmax.f32 %v2779_v36, %v1568_v21  ;;  %v1569_v43 = vmax.f32 %v1559_v41, 0.0  ;;  %v1690_v2 = vmax.f32 %v1684_v58, 0.0  ;;  %v2216_v36 = vld [vmem:[%s2865_s5 + $0x10] sm:$0xff]  }
 0x83f   :  { %v1574_v44 = vmax.f32 %v2782_v25, %v1566_v47  ;;  %v1567_v53 = vmax.f32 %v1551_v61, 0.0  ;;  %v1688_v59 = vmax.f32 %v1676_v46, 0.0  ;;  %v2217_v25 = vld [vmem:[%s2865_s5 + $0x18] sm:$0xff]   ;;  %s2243_s5 = smov [#allocation2]  }
 0x840   :  { %v1577_v37 = vmax.f32 %v2785_v31, %v1569_v43  ;;  %v1692_v50 = vpack.c.bf16 %v1690_v2, %v1689_v54  ;;  %s1787_s23 = sshll.u32 %s2243_s5, 4  ;;  %s1788_s23 = int_to_ptr.vmem [resolvable:$true] %s1787_s23 }
 0x841   :  { %v1575_v57 = vmax.f32 %v2788_v52, %v1567_v53  ;;  %v1691_v5 = vpack.c.bf16 %v1688_v59, %v1687_v51  ;;  %s2218_s24 = scalar_lea.vmem %s1788_s23, 1024  ;;  %p2223_p1 = scmp.lt.s32.totalorder %s1788_s23, %s1788_s23 }
 0x842   :  { %p2219_p0 = scmp.ne.s32.totalorder %s1788_s23, %s2218_s24  ;;  %p2224_p2 = scmp.lt.s32.totalorder %s2218_s24, %s2218_s24 }
 0x843   :  { %2177 = vmatprep.subr.bf16.mxu0 %v1691_v5 }
 0x844   :  { %2178 = vmatpush3.bf16.msra.mxu0 %v1691_v5  ;;  %p2225_p3 = por %p2224_p2, %p2223_p1 }
 0x845   :  { %2179 = vmatprep.subr.bf16.mxu0 %v1692_v50 }
 0x846   :  { %p2226_p4 = pnand %p2225_p3, %p2219_p0 }
 0x848   :  { %2180 = vmatpush3.bf16.msra.mxu0 %v1692_v50 }
 0x84b   :  { %2182 = vmatmul.mubr.msk.bf16.vlgmr.msra.gmra.mrb[56].mxu0 %vm187_vm2, %v2215_v45 }
 0x84c   :  { %2185 = vmatprep.mubr.msk.bf16.mxu0 %vm187_vm2, %v2216_v36 }
 0x853   :  { %2186 = vmatmul.mubr.msk.bf16.gmra.mrb[60].mxu0 %vm187_vm2, %v2217_v25 }
 0x91e   :  { %v2183_v31 = vpop.f32.mrb[56].mxu0 }
 0x91f   :  { %v1736_v52 = vadd.f32 %v2183_v31, %v2490_v8  ;;  %v1727_v4 = vpop.f32.mrb[57].mxu0 }
 0x920   :  { %v1728_v56 = vadd.f32 %v1727_v4, %v2486_v6  ;;  %v2184_v1 = vpop.f32.mrb[58].mxu0 }
 0x921   :  { %v1760_v22 = vmax.f32 %v1736_v52, 0.0  ;;  %v1739_v23 = vadd.f32 %v2184_v1, %v2492_v9  ;;  %v1730_v27 = vpop.f32.mrb[59].mxu0 }
 0x922   :  { %v1758_v30 = vmax.f32 %v1728_v56, 0.0  ;;  %v1731_v12 = vadd.f32 %v1730_v27, %v2488_v7 }
 0x923   :  { %v1768_v14 = vmax.f32 %v1572_v3, %v1760_v22  ;;  %v1761_v60 = vmax.f32 %v1739_v23, 0.0 }
 0x924   :  { %v1766_v17 = vmax.f32 %v1570_v18, %v1758_v30  ;;  %v1759_v11 = vmax.f32 %v1731_v12, 0.0 }
 0x925   :  { %1776 = vst [vmem:[#allocation2 + $0x10] sm:$0xff] %v1768_v14  ;;  %v1769_v16 = vmax.f32 %v1573_v29, %v1761_v60 }
 0x926   :  { %1774 = vst [vmem:[#allocation2] sm:$0xff] %v1766_v17  ;;  %v1767_v15 = vmax.f32 %v1571_v35, %v1759_v11  ;;  %v2187_v8 = vpop.f32.mrb[60].mxu0 }
 0x927   :  { %1777 = vst [vmem:[#allocation2 + $0x18] sm:$0xff] %v1769_v16  ;;  %v1752_v6 = vadd.f32 %v2187_v8, %v2502_v33  ;;  %v1743_v62 = vpop.f32.mrb[61].mxu0 }
 0x928   :  { %1775 = vst [vmem:[#allocation2 + $0x8] sm:$0xff] %v1767_v15  ;;  %v1744_v9 = vadd.f32 %v1743_v62, %v2494_v10  ;;  %v2188_v0 = vpop.f32.mrb[62].mxu0 }
 0x929   :  { %v1764_v28 = vmax.f32 %v1752_v6, 0.0  ;;  %v1755_v7 = vadd.f32 %v2188_v0, %v2505_v40  ;;  %v1746_v3 = vpop.f32.mrb[63].mxu0 }
 0x92a   :  { %v1762_v32 = vmax.f32 %v1744_v9, 0.0  ;;  %v1747_v18 = vadd.f32 %v1746_v3, %v2497_v13 }
 0x92b   :  { %v1772_v29 = vmax.f32 %v1576_v63, %v1764_v28  ;;  %v1765_v35 = vmax.f32 %v1755_v7, 0.0 }
 0x92c   :  { %v1770_v39 = vmax.f32 %v1574_v44, %v1762_v32  ;;  %v1763_v24 = vmax.f32 %v1747_v18, 0.0 }
 0x92d   :  { %1780 = vst [vmem:[#allocation2 + $0x30] sm:$0xff] %v1772_v29  ;;  %v1773_v33 = vmax.f32 %v1577_v37, %v1765_v35 }
 0x92e   :  { %1778 = vst [vmem:[#allocation2 + $0x20] sm:$0xff] %v1770_v39  ;;  %v1771_v38 = vmax.f32 %v1575_v57, %v1763_v24 }
 0x92f   :  { %1781 = vst [vmem:[#allocation2 + $0x38] sm:$0xff] %v1773_v33 }
 0x930   :  { %1779 = vst [vmem:[#allocation2 + $0x28] sm:$0xff] %v1771_v38 }
 0x931   :  { %2229 = shalt.err (!%p2226_p4)
}
 0x932   :  { %s2230_s27 = scalar_lea.hbm %s2867_s7, 1024 }
 0x933   :  { %p2231_p5 = scmp.ne.s32.totalorder %s2867_s7, %s2230_s27  ;;  %p2234_p6 = scmp.lt.u32.totalorder %s2230_s27, %s2867_s7 }
 0x935   :  { %p2236_p7 = pnand %p2234_p6, %p2231_p5 }
 0x937   :  { %2239 = shalt.err (!%p2236_p7)
}
 0x938   :  { %s2244_s8 = smov 128   ;;  %s2245_s9 = smov 8  }
 0x939   :  { %1793 = dma.vmem_to_hbm [thread:$0]  %s1788_s23, 1024, %s2867_s7, [#allocation3], %s2244_s8, %s2244_s8, %s2245_s9  }
 0x93a   :  { %2240 = dma.done.wait [#allocation3], 1024  }
 0x93b   :  { %2241 = vsyncadd [#allocation3], 4294966272 }
 0x93c   :  { %1797 = vsyncpa [#allocation3], 1 }

</bundles_post_ra>
